<compile_context>
chip_gen: v5e
topology: v5e:2x2
jax: 0.10.0
libtpu: 0.0.40
codegen_flags: <defaults>
</compile_context>

<pallas_src>
import jax
import jax.numpy as jnp
from jax.experimental import pallas as pl
from jax.experimental.pallas import tpu as pltpu

LANE = 128          # lane tile (last dim)
SUBLANE_BF16 = 16   # bf16 packed sublane tile (second-to-last dim)

# MXU / HBM-storage dtype: bf16 halves DMA bytes + VMEM footprint and doubles
# MXU throughput on v6e/v7x; accumulation is always f32.  Set to jnp.float32
# for an exact-f32 reference run.
_MXU_DTYPE = jnp.bfloat16


def _round_up(x, m):
    return (x + m - 1) // m * m


# -----------------------------------------------------------------------------
# In-kernel helpers (traced inside the fused kernel body)
# -----------------------------------------------------------------------------

def _mm(a, b):
    """MXU matmul; operands already in _MXU_DTYPE, f32 accumulation."""
    return jnp.dot(a, b, preferred_element_type=jnp.float32)


def _dense(x, w_ref, b_ref, relu):
    """x @ W + b with f32 epilogue; x is _MXU_DTYPE, result f32."""
    y = _mm(x, w_ref[...]) + b_ref[...].astype(jnp.float32)
    return jnp.maximum(y, 0.0) if relu else y


def _mlp(x, layers):
    """plain_last MLP: ReLU on all but the last layer.  x: _MXU_DTYPE, out: f32."""
    n = len(layers)
    y = x.astype(jnp.float32)
    for i, (w_ref, b_ref) in enumerate(layers):
        y = _dense(x, w_ref, b_ref, relu=(i < n - 1))
        if i < n - 1:
            x = y.astype(_MXU_DTYPE)
    return y


def _biconv(adj, src, dst, w_packed_ref, b_ref):
    """dst_new = ReLU([adj @ src, dst] @ [[W_src],[W_dst]] + b).

    Single K=2*hid_pad MXU matmul fuses the neighbour projection and the
    self (dst) projection: fills the 2x256 contraction dim on v6e/v7x and
    folds into two 128 passes on v5e.
    """
    agg = _mm(adj, src).astype(_MXU_DTYPE)          # (n_dst, H)  bf16
    lhs = jnp.concatenate([agg, dst], axis=-1)      # (n_dst, 2H) bf16
    out = _mm(lhs, w_packed_ref[...]) + b_ref[...].astype(jnp.float32)
    return jnp.maximum(out, 0.0)                    # f32


def _make_fused_kernel(E, C, P, B, n_vals):
    """Build the single fused forward kernel for one branch (one grid step)."""

    def kernel(*refs):
        it = iter(refs)
        vals_ref, cons_ref, a_ref = next(it), next(it), next(it)
        enc_vals = [(next(it), next(it)) for _ in range(E)]
        enc_cons = [(next(it), next(it)) for _ in range(E)]
        convs = [(next(it), next(it), next(it), next(it)) for _ in range(C)]
        fc_obj_w, fc_obj_b = next(it), next(it)
        predictor = [(next(it), next(it)) for _ in range(P)]
        fc_nodes = [(next(it), next(it)) for _ in range(B)]
        node_pred = [(next(it), next(it)) for _ in range(P)]
        node_out_ref, obj_out_ref = next(it), next(it)

        a = a_ref[...]                              # (n_cons_p, n_vals_p) bf16
        # A^T hoisted out of the conv loop; computed once per branch.
        # TODO(synk): switch to a native bf16 transpose once verified on the
        # target Mosaic version; the f32 round-trip is the conservative path.
        a_t = a.astype(jnp.float32).T.astype(_MXU_DTYPE)

        # --- encoder MLPs (activations stay VMEM-resident) ---
        v_f32 = _mlp(vals_ref[...], enc_vals)
        c_f32 = _mlp(cons_ref[...], enc_cons)
        v, c = v_f32.astype(_MXU_DTYPE), c_f32.astype(_MXU_DTYPE)

        # --- bipartite message-passing conv layers ---
        for (v2c_w, v2c_b, c2v_w, c2v_b) in convs:
            c_f32 = _biconv(a, v, c, v2c_w, v2c_b)      # vals -> cons
            v_f32 = _biconv(a_t, c, v, c2v_w, c2v_b)    # cons -> vals
            v, c = v_f32.astype(_MXU_DTYPE), c_f32.astype(_MXU_DTYPE)

        # --- pooled objective head (mean over the TRUE n_vals rows) ---
        pooled = jnp.sum(v_f32[:n_vals], axis=0, keepdims=True) * (1.0 / n_vals)
        obj = (_mm(pooled.astype(_MXU_DTYPE), fc_obj_w[...])
               + fc_obj_b[...].astype(jnp.float32))
        obj = _mlp(obj.astype(_MXU_DTYPE), predictor)

        # --- node head ---
        node = jnp.concatenate([v, c], axis=0)          # (n_vals_p + n_cons_p, H)
        if B > 0:
            node = _mlp(node, fc_nodes).astype(_MXU_DTYPE)
        node = _mlp(node, node_pred)

        node_out_ref[...] = node.astype(node_out_ref.dtype)
        obj_out_ref[...] = obj.astype(obj_out_ref.dtype)

    return kernel


# -----------------------------------------------------------------------------
# Parameter construction: padded, bf16, branch-stacked ONCE at init
# -----------------------------------------------------------------------------

def _dense_params(key, din, dout, din_pad, dout_pad, scale=0.1):
    kw, kb = jax.random.split(key)
    w = scale * jax.random.normal(kw, (din, dout), jnp.float32)
    b = scale * jax.random.normal(kb, (1, dout), jnp.float32)
    # zero padding keeps padded lanes exactly 0 through every layer
    w = jnp.pad(w, ((0, din_pad - din), (0, dout_pad - dout)))
    b = jnp.pad(b, ((0, 0), (0, dout_pad - dout)))
    return w.astype(_MXU_DTYPE), b.astype(_MXU_DTYPE)


def _mlp_params(key, dims, dims_pad):
    keys = jax.random.split(key, len(dims) - 1)
    flat = []
    for i in range(len(dims) - 1):
        flat += list(_dense_params(keys[i], dims[i], dims[i + 1],
                                   dims_pad[i], dims_pad[i + 1]))
    return flat          # [w0, b0, w1, b1, ...]


def _conv_params(key, hid, hid_pad):
    """Packed [[W_src],[W_dst]] (2*hid_pad, hid_pad) + bias (distinct src/dst keys)."""
    k_src, k_dst = jax.random.split(key)
    w_src, b = _dense_params(k_src, hid, hid, hid_pad, hid_pad)
    w_dst, _ = _dense_params(k_dst, hid, hid, hid_pad, hid_pad)
    return jnp.concatenate([w_src, w_dst], axis=0), b


def _backbone_branch_params(key, in_dim, hid, in_pad, hid_pad, E, C):
    """Per-branch (one encoder) weights as a flat list matching the kernel order."""
    ks = jax.random.split(key, 2 + 2 * C)
    enc_dims = [in_dim] + [hid] * E
    enc_pads = [in_pad] + [hid_pad] * E
    flat = _mlp_params(ks[0], enc_dims, enc_pads)        # enc_vals
    flat += _mlp_params(ks[1], enc_dims, enc_pads)       # enc_cons
    for l in range(C):
        v2c_w, v2c_b = _conv_params(ks[2 + 2 * l], hid, hid_pad)
        c2v_w, c2v_b = _conv_params(ks[3 + 2 * l], hid, hid_pad)
        flat += [v2c_w, v2c_b, c2v_w, c2v_b]
    return flat


def make_mvgrl_params(key, *, in_dim, hid_dim, num_encode_layers, num_conv_layers,
                      num_pred_layers, backbone_pred_layers):
    assert num_pred_layers > 0
    in_pad = _round_up(in_dim, LANE)
    hid_pad = _round_up(hid_dim, LANE)
    k1, k2, k3, k4, k5, k6 = jax.random.split(key, 6)

    # Per-branch weights (encoder1 / encoder2), pre-stacked on a leading 2 axis.
    b1 = _backbone_branch_params(k1, in_dim, hid_dim, in_pad, hid_pad,
                                 num_encode_layers, num_conv_layers)
    b2 = _backbone_branch_params(k2, in_dim, hid_dim, in_pad, hid_pad,
                                 num_encode_layers, num_conv_layers)
    branch = [jnp.stack([p1, p2]) for p1, p2 in zip(b1, b2)]

    # Shared heads: fc_obj (encoder2.fc_obj = encoder1.fc_obj), predictor,
    # fc_nodes, node_predictor.
    hid_dims = [hid_dim] * (num_pred_layers + 1)
    hid_pads = [hid_pad] * (num_pred_layers + 1)
    shared = list(_dense_params(k3, hid_dim, hid_dim, hid_pad, hid_pad))   # fc_obj
    shared += _mlp_params(k4, hid_dims, hid_pads)                          # predictor
    if backbone_pred_layers > 0:
        shared += _mlp_params(k5, [hid_dim] * (backbone_pred_layers + 1),
                              [hid_pad] * (backbone_pred_layers + 1))      # fc_nodes
    shared += _mlp_params(k6, hid_dims, hid_pads)                          # node_predictor

    return {
        "branch": branch,
        "shared": shared,
        "config": dict(in_dim=in_dim, hid_dim=hid_dim, in_pad=in_pad, hid_pad=hid_pad,
                       num_encode_layers=num_encode_layers,
                       num_conv_layers=num_conv_layers,
                       num_pred_layers=num_pred_layers,
                       backbone_pred_layers=backbone_pred_layers),
    }


# -----------------------------------------------------------------------------
# Forward: one fused pallas_call over a size-2 "parallel" branch grid
# -----------------------------------------------------------------------------

def _flops_estimate(cfg, n_vals_p, n_cons_p):
    E, C, P, B = (cfg["num_encode_layers"], cfg["num_conv_layers"],
                  cfg["num_pred_layers"], cfg["backbone_pred_layers"])
    ip, hp = cfg["in_pad"], cfg["hid_pad"]
    n_total = n_vals_p + n_cons_p
    f = 0
    f += 2 * n_total * ip * hp + 2 * max(E - 1, 0) * n_total * hp * hp      # encoders
    per_conv = (4 * n_cons_p * n_vals_p * hp            # two aggregations
                + 4 * n_total * hp * hp)                # two fused K=2H matmuls
    f += C * per_conv
    f += 2 * hp * hp * (1 + P)                          # fc_obj + predictor
    f += 2 * (B + P) * n_total * hp * hp                # node heads
    return 2 * f                                        # two branches


def mvgrl_forward(params, anchor_data, aug_data):
    cfg = params["config"]
    E, C, P, B = (cfg["num_encode_layers"], cfg["num_conv_layers"],
                  cfg["num_pred_layers"], cfg["backbone_pred_layers"])
    in_pad, hid_pad, hid = cfg["in_pad"], cfg["hid_pad"], cfg["hid_dim"]

    n_vals, n_cons = anchor_data["vals"].shape[0], anchor_data["cons"].shape[0]
    assert aug_data["vals"].shape[0] == n_vals and aug_data["cons"].shape[0] == n_cons
    n_vals_p = _round_up(n_vals, SUBLANE_BF16)
    n_cons_p = _round_up(n_cons, SUBLANE_BF16)
    n_total_p = n_vals_p + n_cons_p

    # Only the graph data is padded/cast per call; all weights were laid out at init.
    def prep(d):
        v = jnp.pad(d["vals"], ((0, n_vals_p - n_vals), (0, in_pad - d["vals"].shape[1])))
        c = jnp.pad(d["cons"], ((0, n_cons_p - n_cons), (0, in_pad - d["cons"].shape[1])))
        a = jnp.pad(d["A"], ((0, n_cons_p - n_cons), (0, n_vals_p - n_vals)))
        return v.astype(_MXU_DTYPE), c.astype(_MXU_DTYPE), a.astype(_MXU_DTYPE)

    v1, c1, a1 = prep(anchor_data)
    v2, c2, a2 = prep(aug_data)
    per_branch = [jnp.stack([v1, v2]), jnp.stack([c1, c2]),
                  jnp.stack([a1, a2])] + params["branch"]
    shared = params["shared"]

    in_specs = (
        [pl.BlockSpec((None,) + tuple(x.shape[1:]), lambda b: (b, 0, 0))
         for x in per_branch] +
        # Shared heads: constant block index -> DMA'd once, reused by both steps.
        # TODO(synk): pipeline_mode=pl.Buffered(1) would drop the redundant
        # second buffer (only matters for VMEM headroom on v7x at large sizes).
        [pl.BlockSpec(tuple(x.shape), lambda b: (0, 0)) for x in shared])

    out_shape = (jax.ShapeDtypeStruct((2, n_total_p, hid_pad), jnp.float32),
                 jax.ShapeDtypeStruct((2, 1, hid_pad), jnp.float32))
    out_specs = (pl.BlockSpec((None, n_total_p, hid_pad), lambda b: (b, 0, 0)),
                 pl.BlockSpec((None, 1, hid_pad), lambda b: (b, 0, 0)))

    in_bytes = sum(int(x.size) * x.dtype.itemsize for x in per_branch + shared)
    out_bytes = (2 * n_total_p * hid_pad + 2 * hid_pad) * 4
    cost = pl.CostEstimate(flops=int(_flops_estimate(cfg, n_vals_p, n_cons_p)),
                           transcendentals=0,
                           bytes_accessed=int(in_bytes + out_bytes))

    kernel = _make_fused_kernel(E, C, P, B, n_vals)
    node_p, obj_p = pl.pallas_call(
        kernel,
        grid=(2,),
        in_specs=in_specs,
        out_specs=out_specs,
        out_shape=out_shape,
        # TODO(synk): on v7x switch to pltpu.CORE_PARALLEL to pin the two
        # independent branches on the two TensorCores; "parallel" is portable.
        compiler_params=pltpu.CompilerParams(
            dimension_semantics=("parallel",),
            vmem_limit_bytes=32 * 1024 * 1024),
        cost_estimate=cost,
    )(*per_branch, *shared)

    # Strip lane/row padding back to logical dims; node = cat([vals, cons]).
    def unpack(b):
        nodes = jnp.concatenate(
            [node_p[b, :n_vals, :hid],
             node_p[b, n_vals_p:n_vals_p + n_cons, :hid]], axis=0)
        return nodes, obj_p[b, :, :hid]

    node1, obj1 = unpack(0)
    node2, obj2 = unpack(1)
    return node1, node2, obj1, obj2


# -----------------------------------------------------------------------------
# Demo
# -----------------------------------------------------------------------------

if __name__ == "__main__":
    key = jax.random.PRNGKey(0)
    kp, ka, kb = jax.random.split(key, 3)

    # small synthetic problem sizes
    N_VALS, N_CONS, IN_DIM, HID = 16, 8, 8, 32

    params = make_mvgrl_params(
        kp,
        in_dim=IN_DIM, hid_dim=HID,
        num_encode_layers=2, num_conv_layers=2,
        num_pred_layers=2, backbone_pred_layers=1,
    )

    def make_data(k):
        k1, k2, k3 = jax.random.split(k, 3)
        return {
            "vals": jax.random.normal(k1, (N_VALS, IN_DIM), jnp.float32),
            "cons": jax.random.normal(k2, (N_CONS, IN_DIM), jnp.float32),
            "A": (jax.random.uniform(k3, (N_CONS, N_VALS)) < 0.3).astype(jnp.float32),
        }

    anchor_data = make_data(ka)
    aug_data = make_data(kb)

    node1, node2, obj1, obj2 = mvgrl_forward(params, anchor_data, aug_data)
    jax.block_until_ready((node1, node2, obj1, obj2))

    assert node1.shape == (N_VALS + N_CONS, HID)
    assert node2.shape == (N_VALS + N_CONS, HID)
    assert obj1.shape == (1, HID)
    assert obj2.shape == (1, HID)
    assert bool(jnp.all(jnp.isfinite(node1)) and jnp.all(jnp.isfinite(node2))
                and jnp.all(jnp.isfinite(obj1)) and jnp.all(jnp.isfinite(obj2)))
    print("KERNEL_OK")
</pallas_src>

<mosaic_0001>
module attributes {stable_mosaic.version = 11 : i64} {
  func.func @kernel(%arg0: i32, %arg1: memref<1x16x128xbf16, #tpu.memory_space<vmem>>, %arg2: memref<1x16x128xbf16, #tpu.memory_space<vmem>>, %arg3: memref<1x16x16xbf16, #tpu.memory_space<vmem>>, %arg4: memref<1x128x128xbf16, #tpu.memory_space<vmem>>, %arg5: memref<1x1x128xbf16, #tpu.memory_space<vmem>>, %arg6: memref<1x128x128xbf16, #tpu.memory_space<vmem>>, %arg7: memref<1x1x128xbf16, #tpu.memory_space<vmem>>, %arg8: memref<1x128x128xbf16, #tpu.memory_space<vmem>>, %arg9: memref<1x1x128xbf16, #tpu.memory_space<vmem>>, %arg10: memref<1x128x128xbf16, #tpu.memory_space<vmem>>, %arg11: memref<1x1x128xbf16, #tpu.memory_space<vmem>>, %arg12: memref<1x256x128xbf16, #tpu.memory_space<vmem>>, %arg13: memref<1x1x128xbf16, #tpu.memory_space<vmem>>, %arg14: memref<1x256x128xbf16, #tpu.memory_space<vmem>>, %arg15: memref<1x1x128xbf16, #tpu.memory_space<vmem>>, %arg16: memref<1x256x128xbf16, #tpu.memory_space<vmem>>, %arg17: memref<1x1x128xbf16, #tpu.memory_space<vmem>>, %arg18: memref<1x256x128xbf16, #tpu.memory_space<vmem>>, %arg19: memref<1x1x128xbf16, #tpu.memory_space<vmem>>, %arg20: memref<128x128xbf16, #tpu.memory_space<vmem>>, %arg21: memref<1x128xbf16, #tpu.memory_space<vmem>>, %arg22: memref<128x128xbf16, #tpu.memory_space<vmem>>, %arg23: memref<1x128xbf16, #tpu.memory_space<vmem>>, %arg24: memref<128x128xbf16, #tpu.memory_space<vmem>>, %arg25: memref<1x128xbf16, #tpu.memory_space<vmem>>, %arg26: memref<128x128xbf16, #tpu.memory_space<vmem>>, %arg27: memref<1x128xbf16, #tpu.memory_space<vmem>>, %arg28: memref<128x128xbf16, #tpu.memory_space<vmem>>, %arg29: memref<1x128xbf16, #tpu.memory_space<vmem>>, %arg30: memref<128x128xbf16, #tpu.memory_space<vmem>>, %arg31: memref<1x128xbf16, #tpu.memory_space<vmem>>, %arg32: memref<1x32x128xf32, #tpu.memory_space<vmem>>, %arg33: memref<1x1x128xf32, #tpu.memory_space<vmem>>) attributes {dimension_semantics = [#tpu.dimension_semantics<parallel>], iteration_bounds = array<i64: 2>, scalar_prefetch = 0 : i64, scratch_operands = 0 : i64, tpu.core_type = #tpu.core_type<tc>, window_params = [{transform_indices = @transform_0, window_bounds = array<i64: 1, 16, 128>}, {transform_indices = @transform_1, window_bounds = array<i64: 1, 16, 128>}, {transform_indices = @transform_2, window_bounds = array<i64: 1, 16, 16>}, {transform_indices = @transform_3, window_bounds = array<i64: 1, 128, 128>}, {transform_indices = @transform_4, window_bounds = array<i64: 1, 1, 128>}, {transform_indices = @transform_5, window_bounds = array<i64: 1, 128, 128>}, {transform_indices = @transform_6, window_bounds = array<i64: 1, 1, 128>}, {transform_indices = @transform_7, window_bounds = array<i64: 1, 128, 128>}, {transform_indices = @transform_8, window_bounds = array<i64: 1, 1, 128>}, {transform_indices = @transform_9, window_bounds = array<i64: 1, 128, 128>}, {transform_indices = @transform_10, window_bounds = array<i64: 1, 1, 128>}, {transform_indices = @transform_11, window_bounds = array<i64: 1, 256, 128>}, {transform_indices = @transform_12, window_bounds = array<i64: 1, 1, 128>}, {transform_indices = @transform_13, window_bounds = array<i64: 1, 256, 128>}, {transform_indices = @transform_14, window_bounds = array<i64: 1, 1, 128>}, {transform_indices = @transform_15, window_bounds = array<i64: 1, 256, 128>}, {transform_indices = @transform_16, window_bounds = array<i64: 1, 1, 128>}, {transform_indices = @transform_17, window_bounds = array<i64: 1, 256, 128>}, {transform_indices = @transform_18, window_bounds = array<i64: 1, 1, 128>}, {pipeline_mode = #tpu.pipeline_mode<synchronous>, transform_indices = @transform_19, window_bounds = array<i64: 128, 128>}, {pipeline_mode = #tpu.pipeline_mode<synchronous>, transform_indices = @transform_20, window_bounds = array<i64: 1, 128>}, {pipeline_mode = #tpu.pipeline_mode<synchronous>, transform_indices = @transform_21, window_bounds = array<i64: 128, 128>}, {pipeline_mode = #tpu.pipeline_mode<synchronous>, transform_indices = @transform_22, window_bounds = array<i64: 1, 128>}, {pipeline_mode = #tpu.pipeline_mode<synchronous>, transform_indices = @transform_23, window_bounds = array<i64: 128, 128>}, {pipeline_mode = #tpu.pipeline_mode<synchronous>, transform_indices = @transform_24, window_bounds = array<i64: 1, 128>}, {pipeline_mode = #tpu.pipeline_mode<synchronous>, transform_indices = @transform_25, window_bounds = array<i64: 128, 128>}, {pipeline_mode = #tpu.pipeline_mode<synchronous>, transform_indices = @transform_26, window_bounds = array<i64: 1, 128>}, {pipeline_mode = #tpu.pipeline_mode<synchronous>, transform_indices = @transform_27, window_bounds = array<i64: 128, 128>}, {pipeline_mode = #tpu.pipeline_mode<synchronous>, transform_indices = @transform_28, window_bounds = array<i64: 1, 128>}, {pipeline_mode = #tpu.pipeline_mode<synchronous>, transform_indices = @transform_29, window_bounds = array<i64: 128, 128>}, {pipeline_mode = #tpu.pipeline_mode<synchronous>, transform_indices = @transform_30, window_bounds = array<i64: 1, 128>}, {transform_indices = @transform_31, window_bounds = array<i64: 1, 32, 128>}, {transform_indices = @transform_32, window_bounds = array<i64: 1, 1, 128>}]} {
    %c0 = arith.constant 0 : index
    %c0_0 = arith.constant 0 : index
    %c0_1 = arith.constant 0 : index
    %0 = vector.load %arg3[%c0, %c0_0, %c0_1] : memref<1x16x16xbf16, #tpu.memory_space<vmem>>, vector<1x16x16xbf16>
    %1 = vector.shape_cast %0 : vector<1x16x16xbf16> to vector<16x16xbf16>
    %2 = arith.extf %1 : vector<16x16xbf16> to vector<16x16xf32>
    %3 = tpu.transpose %2, [1, 0] : vector<16x16xf32> -> vector<16x16xf32>
    %4 = arith.truncf %3 : vector<16x16xf32> to vector<16x16xbf16>
    %c0_2 = arith.constant 0 : index
    %c0_3 = arith.constant 0 : index
    %c0_4 = arith.constant 0 : index
    %5 = vector.load %arg1[%c0_2, %c0_3, %c0_4] : memref<1x16x128xbf16, #tpu.memory_space<vmem>>, vector<1x16x128xbf16>
    %6 = vector.shape_cast %5 : vector<1x16x128xbf16> to vector<16x128xbf16>
    %c0_5 = arith.constant 0 : index
    %c0_6 = arith.constant 0 : index
    %c0_7 = arith.constant 0 : index
    %7 = vector.load %arg4[%c0_5, %c0_6, %c0_7] : memref<1x128x128xbf16, #tpu.memory_space<vmem>>, vector<1x128x128xbf16>
    %8 = vector.shape_cast %7 : vector<1x128x128xbf16> to vector<128x128xbf16>
    %cst = arith.constant dense<0.000000e+00> : vector<16x128xf32>
    %9 = tpu.matmul %6, %8, %cst {dimension_numbers = #tpu.dot_dimension_numbers<[1], [0], [0], [1], [0, 0, 1, 1], [], []>} : vector<16x128xbf16>, vector<128x128xbf16>, vector<16x128xf32> -> vector<16x128xf32>
    %c0_8 = arith.constant 0 : index
    %c0_9 = arith.constant 0 : index
    %c0_10 = arith.constant 0 : index
    %10 = vector.load %arg5[%c0_8, %c0_9, %c0_10] : memref<1x1x128xbf16, #tpu.memory_space<vmem>>, vector<1x1x128xbf16>
    %11 = vector.shape_cast %10 : vector<1x1x128xbf16> to vector<1x128xbf16>
    %12 = arith.extf %11 : vector<1x128xbf16> to vector<1x128xf32>
    %13 = vector.broadcast %12 : vector<1x128xf32> to vector<16x128xf32>
    %14 = arith.addf %9, %13 : vector<16x128xf32>
    %cst_11 = arith.constant 0.000000e+00 : f32
    %15 = vector.broadcast %cst_11 : f32 to vector<16x128xf32>
    %16 = arith.maximumf %14, %15 : vector<16x128xf32>
    %17 = arith.truncf %16 : vector<16x128xf32> to vector<16x128xbf16>
    %c0_12 = arith.constant 0 : index
    %c0_13 = arith.constant 0 : index
    %c0_14 = arith.constant 0 : index
    %18 = vector.load %arg6[%c0_12, %c0_13, %c0_14] : memref<1x128x128xbf16, #tpu.memory_space<vmem>>, vector<1x128x128xbf16>
    %19 = vector.shape_cast %18 : vector<1x128x128xbf16> to vector<128x128xbf16>
    %cst_15 = arith.constant dense<0.000000e+00> : vector<16x128xf32>
    %20 = tpu.matmul %17, %19, %cst_15 {dimension_numbers = #tpu.dot_dimension_numbers<[1], [0], [0], [1], [0, 0, 1, 1], [], []>} : vector<16x128xbf16>, vector<128x128xbf16>, vector<16x128xf32> -> vector<16x128xf32>
    %c0_16 = arith.constant 0 : index
    %c0_17 = arith.constant 0 : index
    %c0_18 = arith.constant 0 : index
    %21 = vector.load %arg7[%c0_16, %c0_17, %c0_18] : memref<1x1x128xbf16, #tpu.memory_space<vmem>>, vector<1x1x128xbf16>
    %22 = vector.shape_cast %21 : vector<1x1x128xbf16> to vector<1x128xbf16>
    %23 = arith.extf %22 : vector<1x128xbf16> to vector<1x128xf32>
    %24 = vector.broadcast %23 : vector<1x128xf32> to vector<16x128xf32>
    %25 = arith.addf %20, %24 : vector<16x128xf32>
    %c0_19 = arith.constant 0 : index
    %c0_20 = arith.constant 0 : index
    %c0_21 = arith.constant 0 : index
    %26 = vector.load %arg2[%c0_19, %c0_20, %c0_21] : memref<1x16x128xbf16, #tpu.memory_space<vmem>>, vector<1x16x128xbf16>
    %27 = vector.shape_cast %26 : vector<1x16x128xbf16> to vector<16x128xbf16>
    %c0_22 = arith.constant 0 : index
    %c0_23 = arith.constant 0 : index
    %c0_24 = arith.constant 0 : index
    %28 = vector.load %arg8[%c0_22, %c0_23, %c0_24] : memref<1x128x128xbf16, #tpu.memory_space<vmem>>, vector<1x128x128xbf16>
    %29 = vector.shape_cast %28 : vector<1x128x128xbf16> to vector<128x128xbf16>
    %cst_25 = arith.constant dense<0.000000e+00> : vector<16x128xf32>
    %30 = tpu.matmul %27, %29, %cst_25 {dimension_numbers = #tpu.dot_dimension_numbers<[1], [0], [0], [1], [0, 0, 1, 1], [], []>} : vector<16x128xbf16>, vector<128x128xbf16>, vector<16x128xf32> -> vector<16x128xf32>
    %c0_26 = arith.constant 0 : index
    %c0_27 = arith.constant 0 : index
    %c0_28 = arith.constant 0 : index
    %31 = vector.load %arg9[%c0_26, %c0_27, %c0_28] : memref<1x1x128xbf16, #tpu.memory_space<vmem>>, vector<1x1x128xbf16>
    %32 = vector.shape_cast %31 : vector<1x1x128xbf16> to vector<1x128xbf16>
    %33 = arith.extf %32 : vector<1x128xbf16> to vector<1x128xf32>
    %34 = vector.broadcast %33 : vector<1x128xf32> to vector<16x128xf32>
    %35 = arith.addf %30, %34 : vector<16x128xf32>
    %cst_29 = arith.constant 0.000000e+00 : f32
    %36 = vector.broadcast %cst_29 : f32 to vector<16x128xf32>
    %37 = arith.maximumf %35, %36 : vector<16x128xf32>
    %38 = arith.truncf %37 : vector<16x128xf32> to vector<16x128xbf16>
    %c0_30 = arith.constant 0 : index
    %c0_31 = arith.constant 0 : index
    %c0_32 = arith.constant 0 : index
    %39 = vector.load %arg10[%c0_30, %c0_31, %c0_32] : memref<1x128x128xbf16, #tpu.memory_space<vmem>>, vector<1x128x128xbf16>
    %40 = vector.shape_cast %39 : vector<1x128x128xbf16> to vector<128x128xbf16>
    %cst_33 = arith.constant dense<0.000000e+00> : vector<16x128xf32>
    %41 = tpu.matmul %38, %40, %cst_33 {dimension_numbers = #tpu.dot_dimension_numbers<[1], [0], [0], [1], [0, 0, 1, 1], [], []>} : vector<16x128xbf16>, vector<128x128xbf16>, vector<16x128xf32> -> vector<16x128xf32>
    %c0_34 = arith.constant 0 : index
    %c0_35 = arith.constant 0 : index
    %c0_36 = arith.constant 0 : index
    %42 = vector.load %arg11[%c0_34, %c0_35, %c0_36] : memref<1x1x128xbf16, #tpu.memory_space<vmem>>, vector<1x1x128xbf16>
    %43 = vector.shape_cast %42 : vector<1x1x128xbf16> to vector<1x128xbf16>
    %44 = arith.extf %43 : vector<1x128xbf16> to vector<1x128xf32>
    %45 = vector.broadcast %44 : vector<1x128xf32> to vector<16x128xf32>
    %46 = arith.addf %41, %45 : vector<16x128xf32>
    %47 = arith.truncf %25 : vector<16x128xf32> to vector<16x128xbf16>
    %48 = arith.truncf %46 : vector<16x128xf32> to vector<16x128xbf16>
    %cst_37 = arith.constant dense<0.000000e+00> : vector<16x128xf32>
    %49 = tpu.matmul %1, %47, %cst_37 {dimension_numbers = #tpu.dot_dimension_numbers<[1], [0], [0], [1], [0, 0, 1, 1], [], []>} : vector<16x16xbf16>, vector<16x128xbf16>, vector<16x128xf32> -> vector<16x128xf32>
    %50 = arith.truncf %49 : vector<16x128xf32> to vector<16x128xbf16>
    %51 = tpu.concatenate %50, %48 in 1 : vector<16x128xbf16>, vector<16x128xbf16> -> vector<16x256xbf16>
    %c0_38 = arith.constant 0 : index
    %c0_39 = arith.constant 0 : index
    %c0_40 = arith.constant 0 : index
    %52 = vector.load %arg12[%c0_38, %c0_39, %c0_40] : memref<1x256x128xbf16, #tpu.memory_space<vmem>>, vector<1x256x128xbf16>
    %53 = vector.shape_cast %52 : vector<1x256x128xbf16> to vector<256x128xbf16>
    %cst_41 = arith.constant dense<0.000000e+00> : vector<16x128xf32>
    %54 = tpu.matmul %51, %53, %cst_41 {dimension_numbers = #tpu.dot_dimension_numbers<[1], [0], [0], [1], [0, 0, 1, 1], [], []>} : vector<16x256xbf16>, vector<256x128xbf16>, vector<16x128xf32> -> vector<16x128xf32>
    %c0_42 = arith.constant 0 : index
    %c0_43 = arith.constant 0 : index
    %c0_44 = arith.constant 0 : index
    %55 = vector.load %arg13[%c0_42, %c0_43, %c0_44] : memref<1x1x128xbf16, #tpu.memory_space<vmem>>, vector<1x1x128xbf16>
    %56 = vector.shape_cast %55 : vector<1x1x128xbf16> to vector<1x128xbf16>
    %57 = arith.extf %56 : vector<1x128xbf16> to vector<1x128xf32>
    %58 = vector.broadcast %57 : vector<1x128xf32> to vector<16x128xf32>
    %59 = arith.addf %54, %58 : vector<16x128xf32>
    %cst_45 = arith.constant 0.000000e+00 : f32
    %60 = vector.broadcast %cst_45 : f32 to vector<16x128xf32>
    %61 = arith.maximumf %59, %60 : vector<16x128xf32>
    %cst_46 = arith.constant dense<0.000000e+00> : vector<16x128xf32>
    %62 = tpu.matmul %4, %48, %cst_46 {dimension_numbers = #tpu.dot_dimension_numbers<[1], [0], [0], [1], [0, 0, 1, 1], [], []>} : vector<16x16xbf16>, vector<16x128xbf16>, vector<16x128xf32> -> vector<16x128xf32>
    %63 = arith.truncf %62 : vector<16x128xf32> to vector<16x128xbf16>
    %64 = tpu.concatenate %63, %47 in 1 : vector<16x128xbf16>, vector<16x128xbf16> -> vector<16x256xbf16>
    %c0_47 = arith.constant 0 : index
    %c0_48 = arith.constant 0 : index
    %c0_49 = arith.constant 0 : index
    %65 = vector.load %arg14[%c0_47, %c0_48, %c0_49] : memref<1x256x128xbf16, #tpu.memory_space<vmem>>, vector<1x256x128xbf16>
    %66 = vector.shape_cast %65 : vector<1x256x128xbf16> to vector<256x128xbf16>
    %cst_50 = arith.constant dense<0.000000e+00> : vector<16x128xf32>
    %67 = tpu.matmul %64, %66, %cst_50 {dimension_numbers = #tpu.dot_dimension_numbers<[1], [0], [0], [1], [0, 0, 1, 1], [], []>} : vector<16x256xbf16>, vector<256x128xbf16>, vector<16x128xf32> -> vector<16x128xf32>
    %c0_51 = arith.constant 0 : index
    %c0_52 = arith.constant 0 : index
    %c0_53 = arith.constant 0 : index
    %68 = vector.load %arg15[%c0_51, %c0_52, %c0_53] : memref<1x1x128xbf16, #tpu.memory_space<vmem>>, vector<1x1x128xbf16>
    %69 = vector.shape_cast %68 : vector<1x1x128xbf16> to vector<1x128xbf16>
    %70 = arith.extf %69 : vector<1x128xbf16> to vector<1x128xf32>
    %71 = vector.broadcast %70 : vector<1x128xf32> to vector<16x128xf32>
    %72 = arith.addf %67, %71 : vector<16x128xf32>
    %cst_54 = arith.constant 0.000000e+00 : f32
    %73 = vector.broadcast %cst_54 : f32 to vector<16x128xf32>
    %74 = arith.maximumf %72, %73 : vector<16x128xf32>
    %75 = arith.truncf %74 : vector<16x128xf32> to vector<16x128xbf16>
    %76 = arith.truncf %61 : vector<16x128xf32> to vector<16x128xbf16>
    %cst_55 = arith.constant dense<0.000000e+00> : vector<16x128xf32>
    %77 = tpu.matmul %1, %75, %cst_55 {dimension_numbers = #tpu.dot_dimension_numbers<[1], [0], [0], [1], [0, 0, 1, 1], [], []>} : vector<16x16xbf16>, vector<16x128xbf16>, vector<16x128xf32> -> vector<16x128xf32>
    %78 = arith.truncf %77 : vector<16x128xf32> to vector<16x128xbf16>
    %79 = tpu.concatenate %78, %76 in 1 : vector<16x128xbf16>, vector<16x128xbf16> -> vector<16x256xbf16>
    %c0_56 = arith.constant 0 : index
    %c0_57 = arith.constant 0 : index
    %c0_58 = arith.constant 0 : index
    %80 = vector.load %arg16[%c0_56, %c0_57, %c0_58] : memref<1x256x128xbf16, #tpu.memory_space<vmem>>, vector<1x256x128xbf16>
    %81 = vector.shape_cast %80 : vector<1x256x128xbf16> to vector<256x128xbf16>
    %cst_59 = arith.constant dense<0.000000e+00> : vector<16x128xf32>
    %82 = tpu.matmul %79, %81, %cst_59 {dimension_numbers = #tpu.dot_dimension_numbers<[1], [0], [0], [1], [0, 0, 1, 1], [], []>} : vector<16x256xbf16>, vector<256x128xbf16>, vector<16x128xf32> -> vector<16x128xf32>
    %c0_60 = arith.constant 0 : index
    %c0_61 = arith.constant 0 : index
    %c0_62 = arith.constant 0 : index
    %83 = vector.load %arg17[%c0_60, %c0_61, %c0_62] : memref<1x1x128xbf16, #tpu.memory_space<vmem>>, vector<1x1x128xbf16>
    %84 = vector.shape_cast %83 : vector<1x1x128xbf16> to vector<1x128xbf16>
    %85 = arith.extf %84 : vector<1x128xbf16> to vector<1x128xf32>
    %86 = vector.broadcast %85 : vector<1x128xf32> to vector<16x128xf32>
    %87 = arith.addf %82, %86 : vector<16x128xf32>
    %cst_63 = arith.constant 0.000000e+00 : f32
    %88 = vector.broadcast %cst_63 : f32 to vector<16x128xf32>
    %89 = arith.maximumf %87, %88 : vector<16x128xf32>
    %cst_64 = arith.constant dense<0.000000e+00> : vector<16x128xf32>
    %90 = tpu.matmul %4, %76, %cst_64 {dimension_numbers = #tpu.dot_dimension_numbers<[1], [0], [0], [1], [0, 0, 1, 1], [], []>} : vector<16x16xbf16>, vector<16x128xbf16>, vector<16x128xf32> -> vector<16x128xf32>
    %91 = arith.truncf %90 : vector<16x128xf32> to vector<16x128xbf16>
    %92 = tpu.concatenate %91, %75 in 1 : vector<16x128xbf16>, vector<16x128xbf16> -> vector<16x256xbf16>
    %c0_65 = arith.constant 0 : index
    %c0_66 = arith.constant 0 : index
    %c0_67 = arith.constant 0 : index
    %93 = vector.load %arg18[%c0_65, %c0_66, %c0_67] : memref<1x256x128xbf16, #tpu.memory_space<vmem>>, vector<1x256x128xbf16>
    %94 = vector.shape_cast %93 : vector<1x256x128xbf16> to vector<256x128xbf16>
    %cst_68 = arith.constant dense<0.000000e+00> : vector<16x128xf32>
    %95 = tpu.matmul %92, %94, %cst_68 {dimension_numbers = #tpu.dot_dimension_numbers<[1], [0], [0], [1], [0, 0, 1, 1], [], []>} : vector<16x256xbf16>, vector<256x128xbf16>, vector<16x128xf32> -> vector<16x128xf32>
    %c0_69 = arith.constant 0 : index
    %c0_70 = arith.constant 0 : index
    %c0_71 = arith.constant 0 : index
    %96 = vector.load %arg19[%c0_69, %c0_70, %c0_71] : memref<1x1x128xbf16, #tpu.memory_space<vmem>>, vector<1x1x128xbf16>
    %97 = vector.shape_cast %96 : vector<1x1x128xbf16> to vector<1x128xbf16>
    %98 = arith.extf %97 : vector<1x128xbf16> to vector<1x128xf32>
    %99 = vector.broadcast %98 : vector<1x128xf32> to vector<16x128xf32>
    %100 = arith.addf %95, %99 : vector<16x128xf32>
    %cst_72 = arith.constant 0.000000e+00 : f32
    %101 = vector.broadcast %cst_72 : f32 to vector<16x128xf32>
    %102 = arith.maximumf %100, %101 : vector<16x128xf32>
    %103 = arith.truncf %102 : vector<16x128xf32> to vector<16x128xbf16>
    %104 = arith.truncf %89 : vector<16x128xf32> to vector<16x128xbf16>
    %cst_73 = arith.constant dense<0.000000e+00> : vector<128xf32>
    %105 = vector.multi_reduction <add>, %102, %cst_73 [0] : vector<16x128xf32> to vector<128xf32>
    %106 = vector.shape_cast %105 : vector<128xf32> to vector<1x128xf32>
    %cst_74 = arith.constant 6.250000e-02 : f32
    %107 = vector.broadcast %cst_74 : f32 to vector<1x128xf32>
    %108 = arith.mulf %106, %107 : vector<1x128xf32>
    %109 = arith.truncf %108 : vector<1x128xf32> to vector<1x128xbf16>
    %c0_75 = arith.constant 0 : index
    %c0_76 = arith.constant 0 : index
    %110 = vector.load %arg20[%c0_75, %c0_76] : memref<128x128xbf16, #tpu.memory_space<vmem>>, vector<128x128xbf16>
    %cst_77 = arith.constant dense<0.000000e+00> : vector<1x128xf32>
    %111 = tpu.matmul %109, %110, %cst_77 {dimension_numbers = #tpu.dot_dimension_numbers<[1], [0], [0], [1], [0, 0, 1, 1], [], []>} : vector<1x128xbf16>, vector<128x128xbf16>, vector<1x128xf32> -> vector<1x128xf32>
    %c0_78 = arith.constant 0 : index
    %c0_79 = arith.constant 0 : index
    %112 = vector.load %arg21[%c0_78, %c0_79] : memref<1x128xbf16, #tpu.memory_space<vmem>>, vector<1x128xbf16>
    %113 = arith.extf %112 : vector<1x128xbf16> to vector<1x128xf32>
    %114 = arith.addf %111, %113 : vector<1x128xf32>
    %115 = arith.truncf %114 : vector<1x128xf32> to vector<1x128xbf16>
    %c0_80 = arith.constant 0 : index
    %c0_81 = arith.constant 0 : index
    %116 = vector.load %arg22[%c0_80, %c0_81] : memref<128x128xbf16, #tpu.memory_space<vmem>>, vector<128x128xbf16>
    %cst_82 = arith.constant dense<0.000000e+00> : vector<1x128xf32>
    %117 = tpu.matmul %115, %116, %cst_82 {dimension_numbers = #tpu.dot_dimension_numbers<[1], [0], [0], [1], [0, 0, 1, 1], [], []>} : vector<1x128xbf16>, vector<128x128xbf16>, vector<1x128xf32> -> vector<1x128xf32>
    %c0_83 = arith.constant 0 : index
    %c0_84 = arith.constant 0 : index
    %118 = vector.load %arg23[%c0_83, %c0_84] : memref<1x128xbf16, #tpu.memory_space<vmem>>, vector<1x128xbf16>
    %119 = arith.extf %118 : vector<1x128xbf16> to vector<1x128xf32>
    %120 = arith.addf %117, %119 : vector<1x128xf32>
    %cst_85 = arith.constant 0.000000e+00 : f32
    %121 = vector.broadcast %cst_85 : f32 to vector<1x128xf32>
    %122 = arith.maximumf %120, %121 : vector<1x128xf32>
    %123 = arith.truncf %122 : vector<1x128xf32> to vector<1x128xbf16>
    %c0_86 = arith.constant 0 : index
    %c0_87 = arith.constant 0 : index
    %124 = vector.load %arg24[%c0_86, %c0_87] : memref<128x128xbf16, #tpu.memory_space<vmem>>, vector<128x128xbf16>
    %cst_88 = arith.constant dense<0.000000e+00> : vector<1x128xf32>
    %125 = tpu.matmul %123, %124, %cst_88 {dimension_numbers = #tpu.dot_dimension_numbers<[1], [0], [0], [1], [0, 0, 1, 1], [], []>} : vector<1x128xbf16>, vector<128x128xbf16>, vector<1x128xf32> -> vector<1x128xf32>
    %c0_89 = arith.constant 0 : index
    %c0_90 = arith.constant 0 : index
    %126 = vector.load %arg25[%c0_89, %c0_90] : memref<1x128xbf16, #tpu.memory_space<vmem>>, vector<1x128xbf16>
    %127 = arith.extf %126 : vector<1x128xbf16> to vector<1x128xf32>
    %128 = arith.addf %125, %127 : vector<1x128xf32>
    %129 = tpu.concatenate %103, %104 in 0 : vector<16x128xbf16>, vector<16x128xbf16> -> vector<32x128xbf16>
    %c0_91 = arith.constant 0 : index
    %c0_92 = arith.constant 0 : index
    %130 = vector.load %arg26[%c0_91, %c0_92] : memref<128x128xbf16, #tpu.memory_space<vmem>>, vector<128x128xbf16>
    %cst_93 = arith.constant dense<0.000000e+00> : vector<32x128xf32>
    %131 = tpu.matmul %129, %130, %cst_93 {dimension_numbers = #tpu.dot_dimension_numbers<[1], [0], [0], [1], [0, 0, 1, 1], [], []>} : vector<32x128xbf16>, vector<128x128xbf16>, vector<32x128xf32> -> vector<32x128xf32>
    %c0_94 = arith.constant 0 : index
    %c0_95 = arith.constant 0 : index
    %132 = vector.load %arg27[%c0_94, %c0_95] : memref<1x128xbf16, #tpu.memory_space<vmem>>, vector<1x128xbf16>
    %133 = arith.extf %132 : vector<1x128xbf16> to vector<1x128xf32>
    %134 = vector.broadcast %133 : vector<1x128xf32> to vector<32x128xf32>
    %135 = arith.addf %131, %134 : vector<32x128xf32>
    %136 = arith.truncf %135 : vector<32x128xf32> to vector<32x128xbf16>
    %c0_96 = arith.constant 0 : index
    %c0_97 = arith.constant 0 : index
    %137 = vector.load %arg28[%c0_96, %c0_97] : memref<128x128xbf16, #tpu.memory_space<vmem>>, vector<128x128xbf16>
    %cst_98 = arith.constant dense<0.000000e+00> : vector<32x128xf32>
    %138 = tpu.matmul %136, %137, %cst_98 {dimension_numbers = #tpu.dot_dimension_numbers<[1], [0], [0], [1], [0, 0, 1, 1], [], []>} : vector<32x128xbf16>, vector<128x128xbf16>, vector<32x128xf32> -> vector<32x128xf32>
    %c0_99 = arith.constant 0 : index
    %c0_100 = arith.constant 0 : index
    %139 = vector.load %arg29[%c0_99, %c0_100] : memref<1x128xbf16, #tpu.memory_space<vmem>>, vector<1x128xbf16>
    %140 = arith.extf %139 : vector<1x128xbf16> to vector<1x128xf32>
    %141 = vector.broadcast %140 : vector<1x128xf32> to vector<32x128xf32>
    %142 = arith.addf %138, %141 : vector<32x128xf32>
    %cst_101 = arith.constant 0.000000e+00 : f32
    %143 = vector.broadcast %cst_101 : f32 to vector<32x128xf32>
    %144 = arith.maximumf %142, %143 : vector<32x128xf32>
    %145 = arith.truncf %144 : vector<32x128xf32> to vector<32x128xbf16>
    %c0_102 = arith.constant 0 : index
    %c0_103 = arith.constant 0 : index
    %146 = vector.load %arg30[%c0_102, %c0_103] : memref<128x128xbf16, #tpu.memory_space<vmem>>, vector<128x128xbf16>
    %cst_104 = arith.constant dense<0.000000e+00> : vector<32x128xf32>
    %147 = tpu.matmul %145, %146, %cst_104 {dimension_numbers = #tpu.dot_dimension_numbers<[1], [0], [0], [1], [0, 0, 1, 1], [], []>} : vector<32x128xbf16>, vector<128x128xbf16>, vector<32x128xf32> -> vector<32x128xf32>
    %c0_105 = arith.constant 0 : index
    %c0_106 = arith.constant 0 : index
    %148 = vector.load %arg31[%c0_105, %c0_106] : memref<1x128xbf16, #tpu.memory_space<vmem>>, vector<1x128xbf16>
    %149 = arith.extf %148 : vector<1x128xbf16> to vector<1x128xf32>
    %150 = vector.broadcast %149 : vector<1x128xf32> to vector<32x128xf32>
    %151 = arith.addf %147, %150 : vector<32x128xf32>
    %c0_107 = arith.constant 0 : index
    %c0_108 = arith.constant 0 : index
    %c0_109 = arith.constant 0 : index
    %152 = vector.load %arg32[%c0_107, %c0_108, %c0_109] : memref<1x32x128xf32, #tpu.memory_space<vmem>>, vector<1x32x128xf32>
    %153 = vector.shape_cast %152 : vector<1x32x128xf32> to vector<32x128xf32>
    %154 = vector.shape_cast %151 : vector<32x128xf32> to vector<1x32x128xf32>
    tpu.vector_store %arg32[%c0_107, %c0_108, %c0_109], %154 {strides = array<i32>} : memref<1x32x128xf32, #tpu.memory_space<vmem>>, vector<1x32x128xf32>,
    %c0_110 = arith.constant 0 : index
    %c0_111 = arith.constant 0 : index
    %c0_112 = arith.constant 0 : index
    %155 = vector.load %arg33[%c0_110, %c0_111, %c0_112] : memref<1x1x128xf32, #tpu.memory_space<vmem>>, vector<1x1x128xf32>
    %156 = vector.shape_cast %155 : vector<1x1x128xf32> to vector<1x128xf32>
    %157 = vector.shape_cast %128 : vector<1x128xf32> to vector<1x1x128xf32>
    tpu.vector_store %arg33[%c0_110, %c0_111, %c0_112], %157 {strides = array<i32>} : memref<1x1x128xf32, #tpu.memory_space<vmem>>, vector<1x1x128xf32>,
    return
  }
  func.func @transform_0(%arg0: i32) -> (i32, i32, i32) {
    %c0_i32 = arith.constant 0 : i32
    %c0_i32_0 = arith.constant 0 : i32
    %c0_i32_1 = arith.constant 0 : i32
    return %arg0, %c0_i32, %c0_i32_0 : i32, i32, i32
  }
  func.func @transform_1(%arg0: i32) -> (i32, i32, i32) {
    %c0_i32 = arith.constant 0 : i32
    %c0_i32_0 = arith.constant 0 : i32
    %c0_i32_1 = arith.constant 0 : i32
    return %arg0, %c0_i32, %c0_i32_0 : i32, i32, i32
  }
  func.func @transform_2(%arg0: i32) -> (i32, i32, i32) {
    %c0_i32 = arith.constant 0 : i32
    %c0_i32_0 = arith.constant 0 : i32
    %c0_i32_1 = arith.constant 0 : i32
    return %arg0, %c0_i32, %c0_i32_0 : i32, i32, i32
  }
  func.func @transform_3(%arg0: i32) -> (i32, i32, i32) {
    %c0_i32 = arith.constant 0 : i32
    %c0_i32_0 = arith.constant 0 : i32
    %c0_i32_1 = arith.constant 0 : i32
    return %arg0, %c0_i32, %c0_i32_0 : i32, i32, i32
  }
  func.func @transform_4(%arg0: i32) -> (i32, i32, i32) {
    %c0_i32 = arith.constant 0 : i32
    %c0_i32_0 = arith.constant 0 : i32
    %c0_i32_1 = arith.constant 0 : i32
    return %arg0, %c0_i32, %c0_i32_0 : i32, i32, i32
  }
  func.func @transform_5(%arg0: i32) -> (i32, i32, i32) {
    %c0_i32 = arith.constant 0 : i32
    %c0_i32_0 = arith.constant 0 : i32
    %c0_i32_1 = arith.constant 0 : i32
    return %arg0, %c0_i32, %c0_i32_0 : i32, i32, i32
  }
  func.func @transform_6(%arg0: i32) -> (i32, i32, i32) {
    %c0_i32 = arith.constant 0 : i32
    %c0_i32_0 = arith.constant 0 : i32
    %c0_i32_1 = arith.constant 0 : i32
    return %arg0, %c0_i32, %c0_i32_0 : i32, i32, i32
  }
  func.func @transform_7(%arg0: i32) -> (i32, i32, i32) {
    %c0_i32 = arith.constant 0 : i32
    %c0_i32_0 = arith.constant 0 : i32
    %c0_i32_1 = arith.constant 0 : i32
    return %arg0, %c0_i32, %c0_i32_0 : i32, i32, i32
  }
  func.func @transform_8(%arg0: i32) -> (i32, i32, i32) {
    %c0_i32 = arith.constant 0 : i32
    %c0_i32_0 = arith.constant 0 : i32
    %c0_i32_1 = arith.constant 0 : i32
    return %arg0, %c0_i32, %c0_i32_0 : i32, i32, i32
  }
  func.func @transform_9(%arg0: i32) -> (i32, i32, i32) {
    %c0_i32 = arith.constant 0 : i32
    %c0_i32_0 = arith.constant 0 : i32
    %c0_i32_1 = arith.constant 0 : i32
    return %arg0, %c0_i32, %c0_i32_0 : i32, i32, i32
  }
  func.func @transform_10(%arg0: i32) -> (i32, i32, i32) {
    %c0_i32 = arith.constant 0 : i32
    %c0_i32_0 = arith.constant 0 : i32
    %c0_i32_1 = arith.constant 0 : i32
    return %arg0, %c0_i32, %c0_i32_0 : i32, i32, i32
  }
  func.func @transform_11(%arg0: i32) -> (i32, i32, i32) {
    %c0_i32 = arith.constant 0 : i32
    %c0_i32_0 = arith.constant 0 : i32
    %c0_i32_1 = arith.constant 0 : i32
    return %arg0, %c0_i32, %c0_i32_0 : i32, i32, i32
  }
  func.func @transform_12(%arg0: i32) -> (i32, i32, i32) {
    %c0_i32 = arith.constant 0 : i32
    %c0_i32_0 = arith.constant 0 : i32
    %c0_i32_1 = arith.constant 0 : i32
    return %arg0, %c0_i32, %c0_i32_0 : i32, i32, i32
  }
  func.func @transform_13(%arg0: i32) -> (i32, i32, i32) {
    %c0_i32 = arith.constant 0 : i32
    %c0_i32_0 = arith.constant 0 : i32
    %c0_i32_1 = arith.constant 0 : i32
    return %arg0, %c0_i32, %c0_i32_0 : i32, i32, i32
  }
  func.func @transform_14(%arg0: i32) -> (i32, i32, i32) {
    %c0_i32 = arith.constant 0 : i32
    %c0_i32_0 = arith.constant 0 : i32
    %c0_i32_1 = arith.constant 0 : i32
    return %arg0, %c0_i32, %c0_i32_0 : i32, i32, i32
  }
  func.func @transform_15(%arg0: i32) -> (i32, i32, i32) {
    %c0_i32 = arith.constant 0 : i32
    %c0_i32_0 = arith.constant 0 : i32
    %c0_i32_1 = arith.constant 0 : i32
    return %arg0, %c0_i32, %c0_i32_0 : i32, i32, i32
  }
  func.func @transform_16(%arg0: i32) -> (i32, i32, i32) {
    %c0_i32 = arith.constant 0 : i32
    %c0_i32_0 = arith.constant 0 : i32
    %c0_i32_1 = arith.constant 0 : i32
    return %arg0, %c0_i32, %c0_i32_0 : i32, i32, i32
  }
  func.func @transform_17(%arg0: i32) -> (i32, i32, i32) {
    %c0_i32 = arith.constant 0 : i32
    %c0_i32_0 = arith.constant 0 : i32
    %c0_i32_1 = arith.constant 0 : i32
    return %arg0, %c0_i32, %c0_i32_0 : i32, i32, i32
  }
  func.func @transform_18(%arg0: i32) -> (i32, i32, i32) {
    %c0_i32 = arith.constant 0 : i32
    %c0_i32_0 = arith.constant 0 : i32
    %c0_i32_1 = arith.constant 0 : i32
    return %arg0, %c0_i32, %c0_i32_0 : i32, i32, i32
  }
  func.func @transform_19(%arg0: i32) -> (i32, i32) {
    %c0_i32 = arith.constant 0 : i32
    %c0_i32_0 = arith.constant 0 : i32
    %c0_i32_1 = arith.constant 0 : i32
    return %c0_i32, %c0_i32_0 : i32, i32
  }
  func.func @transform_20(%arg0: i32) -> (i32, i32) {
    %c0_i32 = arith.constant 0 : i32
    %c0_i32_0 = arith.constant 0 : i32
    %c0_i32_1 = arith.constant 0 : i32
    return %c0_i32, %c0_i32_0 : i32, i32
  }
  func.func @transform_21(%arg0: i32) -> (i32, i32) {
    %c0_i32 = arith.constant 0 : i32
    %c0_i32_0 = arith.constant 0 : i32
    %c0_i32_1 = arith.constant 0 : i32
    return %c0_i32, %c0_i32_0 : i32, i32
  }
  func.func @transform_22(%arg0: i32) -> (i32, i32) {
    %c0_i32 = arith.constant 0 : i32
    %c0_i32_0 = arith.constant 0 : i32
    %c0_i32_1 = arith.constant 0 : i32
    return %c0_i32, %c0_i32_0 : i32, i32
  }
  func.func @transform_23(%arg0: i32) -> (i32, i32) {
    %c0_i32 = arith.constant 0 : i32
    %c0_i32_0 = arith.constant 0 : i32
    %c0_i32_1 = arith.constant 0 : i32
    return %c0_i32, %c0_i32_0 : i32, i32
  }
  func.func @transform_24(%arg0: i32) -> (i32, i32) {
    %c0_i32 = arith.constant 0 : i32
    %c0_i32_0 = arith.constant 0 : i32
    %c0_i32_1 = arith.constant 0 : i32
    return %c0_i32, %c0_i32_0 : i32, i32
  }
  func.func @transform_25(%arg0: i32) -> (i32, i32) {
    %c0_i32 = arith.constant 0 : i32
    %c0_i32_0 = arith.constant 0 : i32
    %c0_i32_1 = arith.constant 0 : i32
    return %c0_i32, %c0_i32_0 : i32, i32
  }
  func.func @transform_26(%arg0: i32) -> (i32, i32) {
    %c0_i32 = arith.constant 0 : i32
    %c0_i32_0 = arith.constant 0 : i32
    %c0_i32_1 = arith.constant 0 : i32
    return %c0_i32, %c0_i32_0 : i32, i32
  }
  func.func @transform_27(%arg0: i32) -> (i32, i32) {
    %c0_i32 = arith.constant 0 : i32
    %c0_i32_0 = arith.constant 0 : i32
    %c0_i32_1 = arith.constant 0 : i32
    return %c0_i32, %c0_i32_0 : i32, i32
  }
  func.func @transform_28(%arg0: i32) -> (i32, i32) {
    %c0_i32 = arith.constant 0 : i32
    %c0_i32_0 = arith.constant 0 : i32
    %c0_i32_1 = arith.constant 0 : i32
    return %c0_i32, %c0_i32_0 : i32, i32
  }
  func.func @transform_29(%arg0: i32) -> (i32, i32) {
    %c0_i32 = arith.constant 0 : i32
    %c0_i32_0 = arith.constant 0 : i32
    %c0_i32_1 = arith.constant 0 : i32
    return %c0_i32, %c0_i32_0 : i32, i32
  }
  func.func @transform_30(%arg0: i32) -> (i32, i32) {
    %c0_i32 = arith.constant 0 : i32
    %c0_i32_0 = arith.constant 0 : i32
    %c0_i32_1 = arith.constant 0 : i32
    return %c0_i32, %c0_i32_0 : i32, i32
  }
  func.func @transform_31(%arg0: i32) -> (i32, i32, i32) {
    %c0_i32 = arith.constant 0 : i32
    %c0_i32_0 = arith.constant 0 : i32
    %c0_i32_1 = arith.constant 0 : i32
    return %arg0, %c0_i32, %c0_i32_0 : i32, i32, i32
  }
  func.func @transform_32(%arg0: i32) -> (i32, i32, i32) {
    %c0_i32 = arith.constant 0 : i32
    %c0_i32_0 = arith.constant 0 : i32
    %c0_i32_1 = arith.constant 0 : i32
    return %arg0, %c0_i32, %c0_i32_0 : i32, i32, i32
  }
}

</mosaic_0001>

<bundles_post_ra>
// kernel: tpu_custom_call.1
= control target key start
LH: loop header
LB: loop body
LE: loop exit
PB: predicated region body
PF: predicated region fallthrough
CT: control target
= control target key end

     0   :  { %s5437_s6 = smov 1   ;;  %s5438_s10 = smov 2   ;;  %s6237_s0 = inlined_call_operand.smem [shape: u32[33], index: -1, kind: input, shape index: {}] }
   0x1   :  { %s5487_s5 = sld [smem:[%s6237_s0]]   ;;  %s5439_s14 = smov 3  }
   0x2   :  { %s5492_s9 = sld [smem:[%s6237_s0 + %s5437_s6]]   ;;  %s5440_s18 = smov 4  }
   0x3   :  { %s5497_s13 = sld [smem:[%s6237_s0 + %s5438_s10]]   ;;  %s5441_s22 = smov 5  }
   0x4   :  { %s5502_s17 = sld [smem:[%s6237_s0 + %s5439_s14]]   ;;  %s5442_s26 = smov 6  }
   0x5   :  { %s5507_s21 = sld [smem:[%s6237_s0 + %s5440_s18]]   ;;  %s5443_s30 = smov 7  }
   0x6   :  { %s5512_s25 = sld [smem:[%s6237_s0 + %s5441_s22]]   ;;  %s5444_s4 = smov 8  }
   0x7   :  { %6273 = sst [smem:[#allocation43_spill]] %s5487_s5  ;;  %s5445_s10 = smov 9  }
   0x8   :  { %s5517_s29 = sld [smem:[%s6237_s0 + %s5442_s26]]   ;;  %s5446_s15 = smov 10  }
   0x9   :  { %6274 = sst [smem:[#allocation44_spill]] %s5497_s13  ;;  %s5447_s20 = smov 11  }
   0xa   :  { %s5522_s3 = sld [smem:[%s6237_s0 + %s5443_s30]]   ;;  %s5448_s26 = smov 12  }
   0xb   :  { %6275 = sst [smem:[#allocation45_spill]] %s5507_s21  ;;  %s5449_s1 = smov 13  }
   0xc   :  { %6276 = sst [smem:[#allocation46_spill]] %s5512_s25  ;;  %s5450_s7 = smov 14  }
   0xd   :  { %s5527_s8 = sld [smem:[%s6237_s0 + %s5444_s4]]   ;;  %s5452_s22 = smov 16  }
   0xe   :  { %6277 = sst [smem:[#allocation47_spill]] %s5517_s29  ;;  %s5453_s28 = smov 17  }
   0xf   :  { %s5532_s14 = sld [smem:[%s6237_s0 + %s5445_s10]]  }
  0x10   :  { %s5537_s19 = sld [smem:[%s6237_s0 + %s5446_s15]]   ;;  %s5451_s15 = smov 15  }
  0x11   :  { %s5542_s24 = sld [smem:[%s6237_s0 + %s5447_s20]]  }
  0x12   :  { %s5547_s30 = sld [smem:[%s6237_s0 + %s5448_s26]]  }
  0x13   :  { %6278 = sst [smem:[#allocation48_spill]] %s5527_s8 }
  0x14   :  { %s5552_s6 = sld [smem:[%s6237_s0 + %s5449_s1]]  }
  0x15   :  { %6279 = sst [smem:[#allocation49_spill]] %s5532_s14 }
  0x16   :  { %6280 = sst [smem:[#allocation50_spill]] %s5537_s19 }
  0x17   :  { %6281 = sst [smem:[#allocation51_spill]] %s5542_s24 }
  0x18   :  { %6282 = sst [smem:[#allocation52_spill]] %s5547_s30 }
  0x19   :  { %s5557_s12 = sld [smem:[%s6237_s0 + %s5450_s7]]   ;;  %s5454_s7 = smov 18  }
  0x1a   :  { %s5562_s20 = sld [smem:[%s6237_s0 + %s5451_s15]]   ;;  %s5455_s15 = smov 19  }
  0x1b   :  { %s5567_s27 = sld [smem:[%s6237_s0 + %s5452_s22]]   ;;  %s5456_s22 = smov 20  }
  0x1c   :  { %s5572_s4 = sld [smem:[%s6237_s0 + %s5453_s28]]   ;;  %s5457_s28 = smov 21  }
  0x1d   :  { %s5582_s30 = sld [smem:[%s6237_s0 + %s5455_s15]]   ;;  %s5459_s15 = smov 23  }
  0x1e   :  { %s5592_s19 = sld [smem:[%s6237_s0 + %s5457_s28]]   ;;  %s5461_s28 = smov 25  }
  0x1f   :  { %6283 = sst [smem:[#allocation53_spill]] %s5557_s12 }
  0x20   :  { %6284 = sst [smem:[#allocation54_spill]] %s5562_s20 }
  0x21   :  { %6285 = sst [smem:[#allocation55_spill]] %s5567_s27 }
  0x22   :  { %6286 = sst [smem:[#allocation56_spill]] %s5572_s4 }
  0x23   :  { %s5577_s12 = sld [smem:[%s6237_s0 + %s5454_s7]]   ;;  %s5458_s7 = smov 22  }
  0x24   :  { %6288 = sst [smem:[#allocation58_spill]] %s5582_s30 }
  0x25   :  { %s5587_s27 = sld [smem:[%s6237_s0 + %s5456_s22]]   ;;  %s5460_s22 = smov 24  }
  0x26   :  { %6290 = sst [smem:[#allocation60_spill]] %s5592_s19 }
  0x27   :  { %s5602_s29 = sld [smem:[%s6237_s0 + %s5459_s15]]   ;;  %s5463_s15 = smov 27  }
  0x28   :  { %s5612_s8 = sld [smem:[%s6237_s0 + %s5461_s28]]   ;;  %s5465_s28 = smov 29  }
  0x29   :  { %6287 = sst [smem:[#allocation57_spill]] %s5577_s12 }
  0x2a   :  { %s5597_s12 = sld [smem:[%s6237_s0 + %s5458_s7]]   ;;  %s5462_s7 = smov 26  }
  0x2b   :  { %6289 = sst [smem:[#allocation59_spill]] %s5587_s27 }
  0x2c   :  { %s5607_s27 = sld [smem:[%s6237_s0 + %s5460_s22]]   ;;  %s5464_s22 = smov 28  }
  0x2d   :  { %s5622_s21 = sld [smem:[%s6237_s0 + %s5463_s15]]   ;;  %s5467_s15 = smov 31  }
  0x2e   :  { %6293 = sst [smem:[#allocation63_spill]] %s5612_s8 }
  0x2f   :  { %s5632_s5 = sld [smem:[%s6237_s0 + %s5465_s28]]  }
  0x30   :  { %6291 = sst [smem:[#allocation61_spill]] %s5597_s12 }
  0x31   :  { %s5617_s12 = sld [smem:[%s6237_s0 + %s5462_s7]]   ;;  %s5466_s7 = smov 30  }
  0x32   :  { %6292 = sst [smem:[#allocation62_spill]] %s5607_s27 }
  0x33   :  { %s5627_s27 = sld [smem:[%s6237_s0 + %s5464_s22]]   ;;  %s5468_s22 = smov 32  }
  0x34   :  { %s5642_s4 = sld [smem:[%s6237_s0 + %s5467_s15]]  }
  0x37   :  { %6294 = sst [smem:[#allocation64_spill]] %s5617_s12 }
  0x38   :  { %s5637_s12 = sld [smem:[%s6237_s0 + %s5466_s7]]  }
  0x39   :  { %6295 = sst [smem:[#allocation65_spill]] %s5627_s27 }
  0x3a   :  { %6297 = sst [smem:[#allocation67_spill]] %s5642_s4 }
  0x3b   :  { %s5647_s27 = sld [smem:[%s6237_s0 + %s5468_s22]]  }
  0x3e   :  { %6296 = sst [smem:[#allocation66_spill]] %s5637_s12 }
  0x41   :  { %6298 = sst [smem:[#allocation68_spill]] %s5647_s27 }
  0x42   :  { %71 = vsyncpa [#allocation3], 0 }
  0x43   :  { %73 = vsyncpa [#allocation3 + $0x1], 0 }
  0x44   :  { %74 = vsyncpa [#allocation6], 0 }
  0x45   :  { %76 = vsyncpa [#allocation6 + $0x1], 0 }
  0x46   :  { %77 = vsyncpa [#allocation9], 0 }
  0x47   :  { %79 = vsyncpa [#allocation9 + $0x1], 0 }
  0x48   :  { %80 = vsyncpa [#allocation12], 0 }
  0x49   :  { %82 = vsyncpa [#allocation12 + $0x1], 0 }
  0x4a   :  { %83 = vsyncpa [#allocation15], 0 }
  0x4b   :  { %85 = vsyncpa [#allocation15 + $0x1], 0 }
  0x4c   :  { %86 = vsyncpa [#allocation18], 0 }
  0x4d   :  { %88 = vsyncpa [#allocation18 + $0x1], 0 }
  0x4e   :  { %89 = vsyncpa [#allocation21], 0 }
  0x4f   :  { %90 = vsyncpa [#allocation24], 0 }
  0x50   :  { %91 = vsyncpa [#allocation27], 0 }
  0x51   :  { %92 = vsyncpa [#allocation4], 0 }
  0x52   :  { %94 = vsyncpa [#allocation4 + $0x1], 0 }
  0x53   :  { %95 = vsyncpa [#allocation30], 0 }
  0x54   :  { %97 = vsyncpa [#allocation30 + $0x1], 0  ;;  %s5649_s0 = smov 0   ;;  %s5651_s28 = smov 0  }
  0x55   :  { %s5653_s1 = smov 0   ;;  %s5655_s2 = smov 0  }
  0x56 LB: > { %s6299_s14 = sld [smem:[#allocation49_spill]]  ;;  %s5673_s10 = sadd.s32 4294967295, %s5435_s2   ;;  %s5427_s28 = sphi %s5651_s28, %s6369_s28   ;;  %s5423_s0 = sphi %s5649_s0, %s6368_s0   ;;  %s5435_s2 = sphi %s5655_s2, %s6367_s2   ;;  %s5431_s1 = sphi %s5653_s1, %s6370_s1  }
  0x57   : > { %s6300_s25 = sld [smem:[#allocation46_spill]]  ;;  %p3813_p0 = scmp.ge.s32.totalorder %s5435_s2, 1 }
  0x58   : > { %s6301_s13 = sld [smem:[#allocation44_spill]]  ;;  %p6258_p1 = scmp.eq.s32.totalorder %s5673_s10, 0 }
  0x59   : > { %s6302_s19 = sld [smem:[#allocation60_spill]]  ;;  %p906_p2 = scmp.lt.s32.totalorder %s5435_s2, 3 }
  0x5a   : > { %s6303_s8 = sld [smem:[#allocation63_spill]]  ;;  %s5469_s15 = smov [#allocation19]  }
  0x5b   : > { %s6304_s30 = sld [smem:[#allocation58_spill]]  ;;  %p5678_p3 = pnand %p3813_p0, %p906_p2 }
  0x5c   : > { %6305 = sst [smem:[#allocation69_spill]] %s5423_s0  ;;  %s5682_s16 = sshll.u32 %s5469_s15, 4  ;;  %s920_s16 = int_to_ptr.vmem [resolvable:$true] %s5682_s16 }
  0x5d   : > { %6306 = sst [smem:[#allocation70_spill]] %s5427_s28  ;;  %p4675_p4 = pneg %p5678_p3 }
  0x5e   : > { %6307 = sst [smem:[#allocation71_spill]] %s5431_s1  ;;  %s5470_s26 = smov [#allocation20]  }
  0x5f   : > { %6308 = sst [smem:[#allocation72_spill]] %s5673_s10  ;;  %s934_s18 = sshll.u32 %s6302_s19, 4  ;;  %s5695_s18 = int_to_ptr.hbm [resolvable:$true] %s934_s18 }
  0x60   : > { %s6309_s11 = scalar_select %p5678_p3, 1, 0 }
  0x61   : > { %s917_s7 = sshll.u32 %s6304_s30, 4  ;;  %p5691_p6 = pnand %p4675_p4, %p6258_p1  ;;  %s5670_s7 = int_to_ptr.hbm [resolvable:$true] %s917_s7 }
  0x62   : > { %6310 = sst [smem:[#allocation73_spill]] %s6309_s11  ;;  %s968_s23 = sshll.u32 %s6303_s8, 4  ;;  %s5718_s23 = int_to_ptr.hbm [resolvable:$true] %s968_s23 }
  0x63   : > { %s5698_s15 = sshll.u32 %s5470_s26, 4  ;;  %s4821_s4 = sshra.s32 %s5670_s7, 4  ;;  %s4822_s4 = int_to_ptr.hbm [resolvable:$true] %s4821_s4  ;;  %s937_s15 = int_to_ptr.vmem [resolvable:$true] %s5698_s15 }
  0x64   : > { %s4823_s27 = scalar_lea.hbm %s4822_s4, 64  ;;  %p5703_p8 = pneg %p5691_p6 }
  0x65   : > { %p4824_p7 = scmp.ne.s32.totalorder %s4822_s4, %s4823_s27  ;;  %s4828_s11 = scalar_lea.hbm %s6304_s30, 64 }
  0x66   : > { %p4829_p11 = scmp.lt.s32.totalorder %s4822_s4, %s6304_s30  ;;  %p4830_p12 = scmp.lt.s32.totalorder %s4828_s11, %s4823_s27 }
  0x67   : > { %p4826_p9 = pnand %p5703_p8, %p4824_p7 }
  0x68   : > { %p4831_p13 = por %p4830_p12, %p4829_p11 }
  0x69   : > { %p4827_p10 = pneg %p4826_p9 }
  0x6b   : > { %p4832_p0 = pnand %p4831_p13, %p4827_p10 }
  0x6d   : > { %4835 = shalt.err (!%p4832_p0)
}
  0x6e   : > { %s6245_s26 = smov 64   ;;  %s6247_s20 = smov 4  }
  0x6f   : > { %4678 = dma.hbm_to_vmem [thread:$0]  (!%p5691_p6), %s5670_s7, 1024, %s920_s16, [#allocation18], %s6245_s26, %s6245_s26, %s6247_s20  }
  0x70   : > { %s4851_s27 = sshra.s32 %s5695_s18, 4  ;;  %s4858_s11 = scalar_lea.hbm %s6302_s19, 64  ;;  %s4852_s27 = int_to_ptr.hbm [resolvable:$true] %s4851_s27 }
  0x71   : > { %s4853_s4 = scalar_lea.hbm %s4852_s27, 64  ;;  %p4859_p9 = scmp.lt.s32.totalorder %s4852_s27, %s6302_s19 }
  0x72   : > { %p4854_p2 = scmp.ne.s32.totalorder %s4852_s27, %s4853_s4  ;;  %p4860_p10 = scmp.lt.s32.totalorder %s4858_s11, %s4853_s4 }
  0x74   : > { %p4856_p4 = pnand %p4854_p2, %p5703_p8  ;;  %p4861_p11 = por %p4860_p10, %p4859_p9 }
  0x76   : > { %p4857_p7 = pneg %p4856_p4 }
  0x78   : > { %p4862_p12 = pnand %p4861_p11, %p4857_p7 }
  0x7a   : > { %4865 = shalt.err (!%p4862_p12)
}
  0x7b   : > { %4681 = dma.hbm_to_vmem [thread:$0]  (!%p5691_p6), %s5695_s18, 1024, %s937_s15, [#allocation21], %s6245_s26, %s6245_s26, %s6247_s20  }
  0x7c   : > { %s5473_s7 = smov [#allocation23]   ;;  %s4881_s30 = sshra.s32 %s5718_s23, 4  ;;  %s4882_s30 = int_to_ptr.hbm [resolvable:$true] %s4881_s30 }
  0x7d   : > { %s970_s16 = sshll.u32 %s5473_s7, 4  ;;  %s4883_s27 = scalar_lea.hbm %s4882_s30, 64  ;;  %s971_s16 = int_to_ptr.vmem [resolvable:$true] %s970_s16 }
  0x7e   : > { %p4884_p13 = scmp.ne.s32.totalorder %s4882_s30, %s4883_s27  ;;  %s4888_s4 = scalar_lea.hbm %s6303_s8, 64 }
  0x7f   : > { %p4889_p4 = scmp.lt.s32.totalorder %s4882_s30, %s6303_s8  ;;  %p4890_p7 = scmp.lt.s32.totalorder %s4888_s4, %s4883_s27 }
  0x80   : > { %p4886_p0 = pnand %p4884_p13, %p5703_p8 }
  0x81   : > { %p4891_p9 = por %p4890_p7, %p4889_p4 }
  0x82   : > { %p4887_p2 = pneg %p4886_p0 }
  0x84   : > { %p4892_p10 = pnand %p4891_p9, %p4887_p2 }
  0x86   : > { %4895 = shalt.err (!%p4892_p10)
}
  0x87   : > { %4687 = dma.hbm_to_vmem [thread:$0]  (!%p5691_p6), %s5718_s23, 1024, %s971_s16, [#allocation24], %s6245_s26, %s6245_s26, %s6247_s20  }
  0x88   : > { %s3812_s30 = sadd.s32 4294967294, %s5435_s2   ;;  %s5744_s18 = sadd.s32 1, %s5435_s2  }
  0x89   : > { %6313 = sst [smem:[#allocation74_spill]] %s5744_s18  ;;  %s136_s15 = sadd.s32 1, %s5431_s1 }
  0x8a   : > { %s133_s11 = ssub.s32 %s5435_s2, %s5744_s18  ;;  %p143_p11 = scmp.ne.s32.totalorder %s5431_s1, %s5427_s28 }
  0x8b   : > { %p134_p12 = scmp.eq.s32.totalorder %s133_s11, 0  ;;  %p144_p13 = scmp.eq.s32.totalorder %s5435_s2, 0 }
  0x8c   : > { %p149_p0 = scmp.ne.s32.totalorder %s5427_s28, %s5423_s0  ;;  %p867_p2 = scmp.eq.s32.totalorder %s5673_s10, 1 }
  0x8d   : > { %s5756_s7 = scalar_select %p134_p12, %s5431_s1, %s136_s15  }
  0x8e   : > { %p145_p4 = por %p144_p13, %p143_p11  ;;  %p5760_p7 = por %p6258_p1, %p149_p0 }
  0x8f   : > { %6314 = sst [smem:[#allocation75_spill]] %s5756_s7  ;;  %p5764_p9 = por %p867_p2, %p143_p11 }
  0x90   : > { %s6315_s23 = scalar_select %p5760_p7, 1, 0 }
  0x91   : > { %s6317_s16 = scalar_select %p5764_p9, 1, 0 }
  0x92   : > { %6316 = sst [smem:[#allocation76_spill]] %s6315_s23  ;;  %p873_p10 = scmp.eq.s32.totalorder %s3812_s30, 1 }
  0x93   : > { %6318 = sst [smem:[#allocation77_spill]] %s6317_s16  ;;  %p4738_p5 = scmp.lt.s32.totalorder %s5435_s2, 2 }
  0x94   : > { %s5770_s27 = sand.u32 1, %s5431_s1   ;;  %p5772_p3 = por %p873_p10, %p149_p0 }
  0x95   : > { %s6259_s15 = sshll.u32 %s5770_s27, 3  ;;  %s6260_s11 = sshll.u32 %s5435_s2, 3 }
  0x96   : > { %s6319_s4 = scalar_select %p5772_p3, 1, 0 }
  0x97   : > { %p5778_p12 = pnand %p4738_p5, %p145_p4  ;;  %s5783_s20 = sand.u32 1, %s5435_s2  }
  0x98   : > { %6320 = sst [smem:[#allocation78_spill]] %s6319_s4  ;;  %s1060_s30 = scalar_lea.hbm %s6301_s13, %s6260_s11 }
  0x99   : > { %s1055_s8 = scalar_lea.vmem [#allocation5], %s6259_s15  ;;  %s1061_s7 = sshll.u32 %s1060_s30, 4  ;;  %s1062_s7 = int_to_ptr.hbm [resolvable:$true] %s1061_s7 }
  0x9a   : > { %s1063_s19 = sshll.u32 %s1055_s8, 4  ;;  %s5791_s1 = sshll.u32 %s5770_s27, 6  ;;  %s1064_s19 = int_to_ptr.vmem [resolvable:$true] %s1063_s19 }
  0x9b   : > { %s6268_s18 = scalar_lea.sflag [#allocation6], %s5783_s20  ;;  %s4911_s4 = sshra.s32 %s1062_s7, 4  ;;  %s4912_s4 = int_to_ptr.hbm [resolvable:$true] %s4911_s4 }
  0x9c   : > { %s4913_s0 = scalar_lea.hbm %s4912_s4, 8  ;;  %p5796_p11 = pneg %p5778_p12 }
  0x9d   : > { %p4914_p5 = scmp.ne.s32.totalorder %s4912_s4, %s4913_s0  ;;  %s4918_s8 = scalar_lea.hbm %s6301_s13, 16 }
  0x9e   : > { %p4919_p2 = scmp.lt.s32.totalorder %s4912_s4, %s6301_s13  ;;  %p4920_p4 = scmp.lt.s32.totalorder %s4918_s8, %s4913_s0 }
  0x9f   : > { %p4916_p13 = pnand %p5796_p11, %p4914_p5 }
  0xa0   : > { %p4921_p10 = por %p4920_p4, %p4919_p2 }
  0xa1   : > { %p4917_p0 = pneg %p4916_p13 }
  0xa3   : > { %p4922_p1 = pnand %p4921_p10, %p4917_p0 }
  0xa5   : > { %4925 = shalt.err (!%p4922_p1)
}
  0xa6   : > { %s6323_s30 = smov 4   ;;  %s6324_s15 = smov 64  }
  0xa7   : > { %4700 = dma.hbm_to_vmem [thread:$0]  (!%p5778_p12), %s1062_s7, 128, %s1064_s19, %s6268_s18, %s6324_s15, %s6324_s15, %s6323_s30  }
  0xa8   : > { %s5812_s4 = sshll.u32 %s5435_s2, 6  ;;  %s1105_s11 = scalar_lea.vmem [#allocation8], %s5791_s1 }
  0xa9   : > { %s1110_s0 = scalar_lea.hbm %s6300_s25, %s5812_s4  ;;  %s1113_s13 = sshll.u32 %s1105_s11, 4  ;;  %s1114_s13 = int_to_ptr.vmem [resolvable:$true] %s1113_s13 }
  0xaa   : > { %s1111_s8 = sshll.u32 %s1110_s0, 4  ;;  %s6270_s10 = scalar_lea.sflag [#allocation9], %s5783_s20  ;;  %s1112_s8 = int_to_ptr.hbm [resolvable:$true] %s1111_s8 }
  0xab   : > { %s4941_s23 = sshra.s32 %s1112_s8, 4  ;;  %s4948_s24 = scalar_lea.hbm %s6300_s25, 128  ;;  %s4942_s23 = int_to_ptr.hbm [resolvable:$true] %s4941_s23 }
  0xac   : > { %s4943_s28 = scalar_lea.hbm %s4942_s23, 64  ;;  %p4949_p0 = scmp.lt.s32.totalorder %s4942_s23, %s6300_s25 }
  0xad   : > { %p4944_p1 = scmp.ne.s32.totalorder %s4942_s23, %s4943_s28  ;;  %p4950_p2 = scmp.lt.s32.totalorder %s4948_s24, %s4943_s28 }
  0xaf   : > { %p4946_p5 = pnand %p4944_p1, %p5796_p11  ;;  %p4951_p4 = por %p4950_p2, %p4949_p0 }
  0xb1   : > { %p4947_p13 = pneg %p4946_p5 }
  0xb3   : > { %p4952_p10 = pnand %p4951_p4, %p4947_p13 }
  0xb5   : > { %4955 = shalt.err (!%p4952_p10)
}
  0xb6   : > { %4706 = dma.hbm_to_vmem [thread:$0]  (!%p5778_p12), %s1112_s8, 1024, %s1114_s13, %s6270_s10, %s6324_s15, %s6324_s15, %s6323_s30  }
  0xb7   : > { %s1166_s19 = scalar_lea.hbm %s6299_s14, %s5812_s4  ;;  %s1161_s24 = scalar_lea.vmem [#allocation11], %s5791_s1 }
  0xb8   : > { %s1169_s28 = sshll.u32 %s1161_s24, 4  ;;  %s1167_s7 = sshll.u32 %s1166_s19, 4  ;;  %s1170_s28 = int_to_ptr.vmem [resolvable:$true] %s1169_s28  ;;  %s1168_s7 = int_to_ptr.hbm [resolvable:$true] %s1167_s7 }
  0xb9   : > { %s5833_s23 = sshll.u32 %s5770_s27, 7  ;;  %s1158_s11 = scalar_lea.sflag [#allocation12], %s5783_s20 }
  0xba   : > { %s4971_s0 = sshra.s32 %s1168_s7, 4  ;;  %s4978_s25 = scalar_lea.hbm %s6299_s14, 128  ;;  %s4972_s0 = int_to_ptr.hbm [resolvable:$true] %s4971_s0 }
  0xbb   : > { %s4973_s18 = scalar_lea.hbm %s4972_s0, 64  ;;  %p4979_p0 = scmp.lt.s32.totalorder %s4972_s0, %s6299_s14 }
  0xbc   : > { %p4974_p1 = scmp.ne.s32.totalorder %s4972_s0, %s4973_s18  ;;  %p4980_p2 = scmp.lt.s32.totalorder %s4978_s25, %s4973_s18 }
  0xbe   : > { %p4976_p5 = pnand %p4974_p1, %p5796_p11  ;;  %p4981_p4 = por %p4980_p2, %p4979_p0 }
  0xc0   : > { %p4977_p13 = pneg %p4976_p5 }
  0xc2   : > { %p4982_p10 = pnand %p4981_p4, %p4977_p13 }
  0xc4   : > { %4985 = shalt.err (!%p4982_p10)
}
  0xc5   : > { %4712 = dma.hbm_to_vmem [thread:$0]  (!%p5778_p12), %s1168_s7, 1024, %s1170_s28, %s1158_s11, %s6324_s15, %s6324_s15, %s6323_s30  }
  0xc6   : > { %s5848_s13 = sshll.u32 %s5435_s2, 7  ;;  %s1217_s8 = scalar_lea.vmem [#allocation14], %s5833_s23 }
  0xc7   : > { %s1222_s25 = scalar_lea.hbm %s5552_s6, %s5848_s13  ;;  %s1225_s19 = sshll.u32 %s1217_s8, 4  ;;  %s1226_s19 = int_to_ptr.vmem [resolvable:$true] %s1225_s19 }
  0xc8   : > { %s1223_s18 = sshll.u32 %s1222_s25, 4  ;;  %s6272_s24 = scalar_lea.sflag [#allocation15], %s5783_s20  ;;  %s1224_s18 = int_to_ptr.hbm [resolvable:$true] %s1223_s18 }
  0xc9   : > { %s5001_s0 = sshra.s32 %s1224_s18, 4  ;;  %s5008_s14 = scalar_lea.hbm %s5552_s6, 256  ;;  %s5002_s0 = int_to_ptr.hbm [resolvable:$true] %s5001_s0 }
  0xca   : > { %s5003_s10 = scalar_lea.hbm %s5002_s0, 128  ;;  %p5009_p0 = scmp.lt.s32.totalorder %s5002_s0, %s5552_s6 }
  0xcb   : > { %p5004_p1 = scmp.ne.s32.totalorder %s5002_s0, %s5003_s10  ;;  %p5010_p2 = scmp.lt.s32.totalorder %s5008_s14, %s5003_s10 }
  0xcd   : > { %p5006_p5 = pnand %p5004_p1, %p5796_p11  ;;  %p5011_p4 = por %p5010_p2, %p5009_p0 }
  0xcf   : > { %p5007_p13 = pneg %p5006_p5 }
  0xd1   : > { %p5012_p10 = pnand %p5011_p4, %p5007_p13 }
  0xd3   : > { %5015 = shalt.err (!%p5012_p10)
}
  0xd4   : > { %4718 = dma.hbm_to_vmem [thread:$0]  (!%p5778_p12), %s1224_s18, 2048, %s1226_s19, %s6272_s24, %s6324_s15, %s6324_s15, %s6323_s30  }
  0xd5   : > { %s951_s28 = sshll.u32 %s5602_s29, 4  ;;  %s5474_s7 = smov [#allocation22]   ;;  %s952_s28 = int_to_ptr.hbm [resolvable:$true] %s951_s28 }
  0xd6   : > { %s953_s14 = sshll.u32 %s5474_s7, 4  ;;  %s985_s10 = sshll.u32 %s5622_s21, 4  ;;  %s954_s14 = int_to_ptr.vmem [resolvable:$true] %s953_s14  ;;  %s986_s10 = int_to_ptr.hbm [resolvable:$true] %s985_s10 }
  0xd7   : > { %s5031_s25 = sshra.s32 %s952_s28, 4  ;;  %s5038_s0 = scalar_lea.hbm %s5602_s29, 64  ;;  %s5032_s25 = int_to_ptr.hbm [resolvable:$true] %s5031_s25 }
  0xd8   : > { %s5033_s8 = scalar_lea.hbm %s5032_s25, 64  ;;  %p5039_p0 = scmp.lt.s32.totalorder %s5032_s25, %s5602_s29 }
  0xd9   : > { %p5034_p1 = scmp.ne.s32.totalorder %s5032_s25, %s5033_s8  ;;  %p5040_p2 = scmp.lt.s32.totalorder %s5038_s0, %s5033_s8 }
  0xdb   : > { %p5036_p5 = pnand %p5034_p1, %p5703_p8  ;;  %p5041_p4 = por %p5040_p2, %p5039_p0 }
  0xdd   : > { %p5037_p13 = pneg %p5036_p5 }
  0xdf   : > { %p5042_p10 = pnand %p5041_p4, %p5037_p13 }
  0xe1   : > { %5045 = shalt.err (!%p5042_p10)
}
  0xe2   : > { %4684 = dma.hbm_to_vmem [thread:$0]  (!%p5691_p6), %s952_s28, 1024, %s954_s14, [#allocation21], %s6324_s15, %s6324_s15, %s6323_s30  }
  0xe3   : > { %s5475_s18 = smov [#allocation25]   ;;  %s1002_s7 = sshll.u32 %s5632_s5, 4  ;;  %s5877_s7 = int_to_ptr.hbm [resolvable:$true] %s1002_s7 }
  0xe4   : > { %s987_s19 = sshll.u32 %s5475_s18, 4  ;;  %s5061_s25 = sshra.s32 %s986_s10, 4  ;;  %s988_s19 = int_to_ptr.vmem [resolvable:$true] %s987_s19  ;;  %s5062_s25 = int_to_ptr.hbm [resolvable:$true] %s5061_s25 }
  0xe5   : > { %s5063_s8 = scalar_lea.hbm %s5062_s25, 64  ;;  %s5068_s0 = scalar_lea.hbm %s5622_s21, 64 }
  0xe6   : > { %p5064_p1 = scmp.ne.s32.totalorder %s5062_s25, %s5063_s8  ;;  %p5069_p0 = scmp.lt.s32.totalorder %s5062_s25, %s5622_s21 }
  0xe7   : > { %p5070_p2 = scmp.lt.s32.totalorder %s5068_s0, %s5063_s8 }
  0xe8   : > { %p5066_p5 = pnand %p5064_p1, %p5703_p8 }
  0xe9   : > { %p5071_p4 = por %p5070_p2, %p5069_p0 }
  0xea   : > { %p5067_p13 = pneg %p5066_p5 }
  0xec   : > { %p5072_p10 = pnand %p5071_p4, %p5067_p13 }
  0xee   : > { %5075 = shalt.err (!%p5072_p10)
}
  0xef   : > { %4690 = dma.hbm_to_vmem [thread:$0]  (!%p5691_p6), %s986_s10, 1024, %s988_s19, [#allocation24], %s6324_s15, %s6324_s15, %s6323_s30  }
  0xf0   : > { %s5476_s28 = smov [#allocation26]   ;;  %s6325_s18 = sshll.u32 %s5435_s2, 3 }
  0xf1   : > { %s1004_s14 = sshll.u32 %s5476_s28, 4  ;;  %s1038_s25 = scalar_lea.hbm %s5492_s9, %s6325_s18  ;;  %s1005_s14 = int_to_ptr.vmem [resolvable:$true] %s1004_s14 }
  0xf2   : > { %s5091_s8 = sshra.s32 %s5877_s7, 4  ;;  %s5098_s24 = scalar_lea.hbm %s5632_s5, 64  ;;  %s5092_s8 = int_to_ptr.hbm [resolvable:$true] %s5091_s8 }
  0xf3   : > { %s5093_s0 = scalar_lea.hbm %s5092_s8, 64  ;;  %p5099_p0 = scmp.lt.s32.totalorder %s5092_s8, %s5632_s5 }
  0xf4   : > { %p5094_p1 = scmp.ne.s32.totalorder %s5092_s8, %s5093_s0  ;;  %p5100_p2 = scmp.lt.s32.totalorder %s5098_s24, %s5093_s0 }
  0xf6   : > { %p5096_p5 = pnand %p5094_p1, %p5703_p8  ;;  %p5101_p4 = por %p5100_p2, %p5099_p0 }
  0xf8   : > { %p5097_p13 = pneg %p5096_p5 }
  0xfa   : > { %p5102_p10 = pnand %p5101_p4, %p5097_p13 }
  0xfc   : > { %5105 = shalt.err (!%p5102_p10)
}
  0xfd   : > { %4693 = dma.hbm_to_vmem [thread:$0]  (!%p5691_p6), %s5877_s7, 1024, %s1005_s14, [#allocation27], %s6324_s15, %s6324_s15, %s6323_s30  }
  0xfe   : > { %s1039_s12 = sshll.u32 %s1038_s25, 4  ;;  %s6326_s10 = sshll.u32 %s5770_s27, 3  ;;  %s1040_s12 = int_to_ptr.hbm [resolvable:$true] %s1039_s12 }
  0xff   : > { %s1033_s19 = scalar_lea.vmem [#allocation2], %s6326_s10  ;;  %s1030_s24 = scalar_lea.sflag [#allocation3], %s5770_s27 }
 0x100   : > { %s1041_s28 = sshll.u32 %s1033_s19, 4  ;;  %s5121_s18 = sshra.s32 %s1040_s12, 4  ;;  %s1042_s28 = int_to_ptr.vmem [resolvable:$true] %s1041_s28  ;;  %s5122_s18 = int_to_ptr.hbm [resolvable:$true] %s5121_s18 }
 0x101   : > { %s5123_s22 = scalar_lea.hbm %s5122_s18, 8  ;;  %s5128_s8 = scalar_lea.hbm %s5492_s9, 16 }
 0x102   : > { %p5124_p8 = scmp.ne.s32.totalorder %s5122_s18, %s5123_s22  ;;  %p5129_p13 = scmp.lt.s32.totalorder %s5122_s18, %s5492_s9 }
 0x103   : > { %p5130_p0 = scmp.lt.s32.totalorder %s5128_s8, %s5123_s22 }
 0x104   : > { %p5126_p1 = pnand %p5124_p8, %p5796_p11 }
 0x105   : > { %p5131_p2 = por %p5130_p0, %p5129_p13 }
 0x106   : > { %p5127_p5 = pneg %p5126_p1 }
 0x108   : > { %p5132_p4 = pnand %p5131_p2, %p5127_p5 }
 0x10a   : > { %5135 = shalt.err (!%p5132_p4)
}
 0x10b   : > { %4697 = dma.hbm_to_vmem [thread:$0]  (!%p5778_p12), %s1040_s12, 128, %s1042_s28, %s1030_s24, %s6324_s15, %s6324_s15, %s6323_s30  }
 0x10c   : > { %s1082_s27 = scalar_lea.hbm %s5502_s17, %s5812_s4  ;;  %s1077_s14 = scalar_lea.vmem [#allocation7], %s5791_s1 }
 0x10d   : > { %s1083_s7 = sshll.u32 %s1082_s27, 4  ;;  %s1085_s25 = sshll.u32 %s1077_s14, 4  ;;  %s1084_s7 = int_to_ptr.hbm [resolvable:$true] %s1083_s7  ;;  %s1086_s25 = int_to_ptr.vmem [resolvable:$true] %s1085_s25 }
 0x10e   : > { %s5151_s0 = sshra.s32 %s1084_s7, 4  ;;  %s5158_s19 = scalar_lea.hbm %s5502_s17, 128  ;;  %s5152_s0 = int_to_ptr.hbm [resolvable:$true] %s5151_s0 }
 0x10f   : > { %s5153_s10 = scalar_lea.hbm %s5152_s0, 64  ;;  %p5159_p1 = scmp.lt.s32.totalorder %s5152_s0, %s5502_s17 }
 0x110   : > { %p5154_p6 = scmp.ne.s32.totalorder %s5152_s0, %s5153_s10  ;;  %p5160_p5 = scmp.lt.s32.totalorder %s5158_s19, %s5153_s10 }
 0x112   : > { %p5156_p10 = pnand %p5154_p6, %p5796_p11  ;;  %p5161_p13 = por %p5160_p5, %p5159_p1 }
 0x114   : > { %p5157_p8 = pneg %p5156_p10 }
 0x116   : > { %p5162_p0 = pnand %p5161_p13, %p5157_p8 }
 0x118   : > { %5165 = shalt.err (!%p5162_p0)
}
 0x119   : > { %s6327_s12 = scalar_lea.sflag [#allocation6], %s5783_s20  ;;  %s1138_s28 = scalar_lea.hbm %s5522_s3, %s5812_s4 }
 0x11a   : > { %4703 = dma.hbm_to_vmem [thread:$0]  (!%p5778_p12), %s1084_s7, 1024, %s1086_s25, %s6327_s12, %s6324_s15, %s6324_s15, %s6323_s30  }
 0x11b   : > { %s1139_s24 = sshll.u32 %s1138_s28, 4  ;;  %s1133_s18 = scalar_lea.vmem [#allocation10], %s5791_s1  ;;  %s1140_s24 = int_to_ptr.hbm [resolvable:$true] %s1139_s24 }
 0x11c   : > { %s1141_s22 = sshll.u32 %s1133_s18, 4  ;;  %s5181_s8 = sshra.s32 %s1140_s24, 4  ;;  %s1142_s22 = int_to_ptr.vmem [resolvable:$true] %s1141_s22  ;;  %s5182_s8 = int_to_ptr.hbm [resolvable:$true] %s5181_s8 }
 0x11d   : > { %s5183_s27 = scalar_lea.hbm %s5182_s8, 64  ;;  %s5188_s14 = scalar_lea.hbm %s5522_s3, 128 }
 0x11e   : > { %p5184_p2 = scmp.ne.s32.totalorder %s5182_s8, %s5183_s27  ;;  %p5189_p10 = scmp.lt.s32.totalorder %s5182_s8, %s5522_s3 }
 0x11f   : > { %p5190_p8 = scmp.lt.s32.totalorder %s5188_s14, %s5183_s27 }
 0x120   : > { %p5186_p4 = pnand %p5184_p2, %p5796_p11 }
 0x121   : > { %p5191_p1 = por %p5190_p8, %p5189_p10 }
 0x122   : > { %p5187_p6 = pneg %p5186_p4 }
 0x124   : > { %p5192_p5 = pnand %p5191_p1, %p5187_p6 }
 0x126   : > { %5195 = shalt.err (!%p5192_p5)
}
 0x127   : > { %s6328_s1 = scalar_lea.sflag [#allocation9], %s5783_s20  ;;  %s6329_s4 = sld [smem:[#allocation51_spill]] }
 0x128   : > { %4709 = dma.hbm_to_vmem [thread:$0]  (!%p5778_p12), %s1140_s24, 1024, %s1142_s22, %s6328_s1, %s6324_s15, %s6324_s15, %s6323_s30  }
 0x129   : > { %s1189_s0 = scalar_lea.vmem [#allocation13], %s5833_s23 }
 0x12a   : > { %s1197_s10 = sshll.u32 %s1189_s0, 4  ;;  %s1198_s10 = int_to_ptr.vmem [resolvable:$true] %s1197_s10 }
 0x12d   : > { %s1194_s7 = scalar_lea.hbm %s6329_s4, %s5848_s13  ;;  %s5218_s28 = scalar_lea.hbm %s6329_s4, 256 }
 0x12e   : > { %s1195_s25 = sshll.u32 %s1194_s7, 4  ;;  %s1196_s25 = int_to_ptr.hbm [resolvable:$true] %s1195_s25 }
 0x12f   : > { %s5211_s19 = sshra.s32 %s1196_s25, 4  ;;  %s5212_s19 = int_to_ptr.hbm [resolvable:$true] %s5211_s19 }
 0x130   : > { %s5213_s12 = scalar_lea.hbm %s5212_s19, 128  ;;  %p5219_p4 = scmp.lt.s32.totalorder %s5212_s19, %s6329_s4 }
 0x131   : > { %p5214_p13 = scmp.ne.s32.totalorder %s5212_s19, %s5213_s12  ;;  %p5220_p6 = scmp.lt.s32.totalorder %s5218_s28, %s5213_s12 }
 0x133   : > { %p5216_p0 = pnand %p5214_p13, %p5796_p11  ;;  %p5221_p10 = por %p5220_p6, %p5219_p4 }
 0x135   : > { %p5217_p2 = pneg %p5216_p0 }
 0x137   : > { %p5222_p8 = pnand %p5221_p10, %p5217_p2 }
 0x139   : > { %5225 = shalt.err (!%p5222_p8)
}
 0x13a   : > { %s6330_s24 = sld [smem:[#allocation54_spill]]  ;;  %s1245_s8 = scalar_lea.vmem [#allocation16], %s5833_s23 }
 0x13b   : > { %4715 = dma.hbm_to_vmem [thread:$0]  (!%p5778_p12), %s1196_s25, 2048, %s1198_s10, %s1158_s11, %s6324_s15, %s6324_s15, %s6323_s30  }
 0x13c   : > { %s1253_s27 = sshll.u32 %s1245_s8, 4  ;;  %s1254_s27 = int_to_ptr.vmem [resolvable:$true] %s1253_s27 }
 0x140   : > { %s1250_s18 = scalar_lea.hbm %s6330_s24, %s5848_s13  ;;  %s5248_s7 = scalar_lea.hbm %s6330_s24, 256 }
 0x141   : > { %s1251_s22 = sshll.u32 %s1250_s18, 4  ;;  %s1252_s22 = int_to_ptr.hbm [resolvable:$true] %s1251_s22 }
 0x142   : > { %s5241_s14 = sshra.s32 %s1252_s22, 4  ;;  %s5242_s14 = int_to_ptr.hbm [resolvable:$true] %s5241_s14 }
 0x143   : > { %s5243_s1 = scalar_lea.hbm %s5242_s14, 128  ;;  %p5249_p0 = scmp.lt.s32.totalorder %s5242_s14, %s6330_s24 }
 0x144   : > { %p5244_p1 = scmp.ne.s32.totalorder %s5242_s14, %s5243_s1  ;;  %p5250_p2 = scmp.lt.s32.totalorder %s5248_s7, %s5243_s1 }
 0x146   : > { %p5246_p5 = pnand %p5244_p1, %p5796_p11  ;;  %p5251_p4 = por %p5250_p2, %p5249_p0 }
 0x148   : > { %p5247_p13 = pneg %p5246_p5 }
 0x14a   : > { %p5252_p6 = pnand %p5251_p4, %p5247_p13 }
 0x14c   : > { %5255 = shalt.err (!%p5252_p6)
}
 0x14d   : > { %s6331_s11 = scalar_lea.sflag [#allocation15], %s5783_s20  ;;  %s6332_s25 = sld [smem:[#allocation56_spill]] }
 0x14e   : > { %4721 = dma.hbm_to_vmem [thread:$0]  (!%p5778_p12), %s1252_s22, 2048, %s1254_s27, %s6331_s11, %s6324_s15, %s6324_s15, %s6323_s30  }
 0x14f   : > { %s1273_s10 = scalar_lea.vmem [#allocation17], %s5833_s23  ;;  %s1270_s28 = scalar_lea.sflag [#allocation18], %s5783_s20 }
 0x150   : > { %s1281_s19 = sshll.u32 %s1273_s10, 4  ;;  %s1282_s19 = int_to_ptr.vmem [resolvable:$true] %s1281_s19 }
 0x153   : > { %s1278_s0 = scalar_lea.hbm %s6332_s25, %s5848_s13  ;;  %s5278_s14 = scalar_lea.hbm %s6332_s25, 256 }
 0x154   : > { %s1279_s12 = sshll.u32 %s1278_s0, 4  ;;  %s1280_s12 = int_to_ptr.hbm [resolvable:$true] %s1279_s12 }
 0x155   : > { %s5271_s18 = sshra.s32 %s1280_s12, 4  ;;  %s5272_s18 = int_to_ptr.hbm [resolvable:$true] %s5271_s18 }
 0x156   : > { %s5273_s8 = scalar_lea.hbm %s5272_s18, 128  ;;  %p5279_p5 = scmp.lt.s32.totalorder %s5272_s18, %s6332_s25 }
 0x157   : > { %p5274_p10 = scmp.ne.s32.totalorder %s5272_s18, %s5273_s8  ;;  %p5280_p13 = scmp.lt.s32.totalorder %s5278_s14, %s5273_s8 }
 0x159   : > { %p5276_p8 = pnand %p5274_p10, %p5796_p11  ;;  %p5281_p0 = por %p5280_p13, %p5279_p5 }
 0x15b   : > { %p5277_p1 = pneg %p5276_p8 }
 0x15d   : > { %p5282_p2 = pnand %p5281_p0, %p5277_p1 }
 0x15f   : > { %5285 = shalt.err (!%p5282_p2)
}
 0x160   : > { %4724 = dma.hbm_to_vmem [thread:$0]  (!%p5778_p12), %s1280_s12, 2048, %s1282_s19, %s1270_s28, %s6324_s15, %s6324_s15, %s6323_s30  }
 0x161   : > { %s6333_s20 = sld [smem:[#allocation73_spill]] }
 0x167   : > { %p6334_p4 = scmp.ne.s32.totalorder %s6333_s20, 0 }
 0x168   : > { %s6335_s23 = sld [smem:[#allocation70_spill]] (!%p6334_p4) }
 0x169   : > { %1299 = sbr.rel (%p6334_p4) target bundleno = 1749 (0x6d5), region = 144 }
 0x16e   : > { %s5986_s16 = sand.u32 1, %s6335_s23  }
 0x16f   : > { %s3852_s22 = sshll.u32 %s5986_s16, 3  ;;  %s1302_s27 = scalar_lea.sflag [#allocation3], %s5986_s16 }
 0x170   : > { %s5990_s1 = scalar_lea.vmem [#allocation2], %s3852_s22 }
 0x171   : > { %5374 = dma.done.wait (%p5760_p7), %s1302_s27, 128  }
 0x172   : > { %5376 = vsyncadd (%p5760_p7), %s1302_s27, 4294967168  ;;  %s6337_s26 = sld [smem:[#allocation72_spill]]  ;;  %s5997_s7 = scalar_lea.vmem [#allocation5], %s3852_s22 }
 0x178   : > { %s1311_s15 = sand.u32 1, %s6337_s26  }
 0x179   : > { %s1312_s30 = scalar_lea.sflag [#allocation6], %s1311_s15 }
 0x17a   : > { %5378 = dma.done.wait (%p5760_p7), %s1312_s30, 1152  }
 0x17b   : > { %5380 = vsyncadd (%p5760_p7), %s1312_s30, 4294966144  ;;  %s3854_s11 = sshll.u32 %s5986_s16, 6  ;;  %s1332_s10 = scalar_lea.sflag [#allocation9], %s1311_s15 }
 0x17c   : > { %s6004_s0 = scalar_lea.vmem [#allocation7], %s3854_s11  ;;  %s6006_s19 = scalar_lea.vmem [#allocation8], %s3854_s11 }
 0x17d   : > { %5382 = dma.done.wait (%p5760_p7), %s1332_s10, 2048  }
 0x17e   : > { %5384 = vsyncadd (%p5760_p7), %s1332_s10, 4294965248  ;;  %s6012_s12 = scalar_lea.vmem [#allocation10], %s3854_s11  ;;  %s1352_s28 = scalar_lea.sflag [#allocation12], %s1311_s15 }
 0x17f   : > { %s6014_s18 = scalar_lea.vmem [#allocation11], %s3854_s11 }
 0x180   : > { %5386 = dma.done.wait (%p5760_p7), %s1352_s28, 3072  }
 0x181   : > { %5388 = vsyncadd (%p5760_p7), %s1352_s28, 4294964224  ;;  %s3858_s8 = sshll.u32 %s5986_s16, 7  ;;  %s1372_s20 = scalar_lea.sflag [#allocation15], %s1311_s15 }
 0x182   : > { %s6021_s14 = scalar_lea.vmem [#allocation13], %s3858_s8  ;;  %s6023_s23 = scalar_lea.vmem [#allocation14], %s3858_s8 }
 0x183   : > { %5390 = dma.done.wait (%p5760_p7), %s1372_s20, 4096  }
 0x184   : > { %5392 = vsyncadd (%p5760_p7), %s1372_s20, 4294963200  ;;  %s6029_s22 = scalar_lea.vmem [#allocation16], %s3858_s8  ;;  %s1392_s27 = scalar_lea.sflag [#allocation18], %s1311_s15 }
 0x185   : > { %s6031_s30 = scalar_lea.vmem [#allocation17], %s3858_s8 }
 0x186   : > { %5394 = dma.done.wait (%p5760_p7), %s1392_s27, 2048  }
 0x187   : > { %5396 = vsyncadd (%p5760_p7), %s1392_s27, 4294965248  ;;  %p6338_p12 = scmp.eq.s32.totalorder %s6337_s26, 0 }
 0x189   : > { %5398 = dma.done.wait (%p6338_p12), [#allocation18], 1024   ;;  %p6339_p11 = pmov %p6338_p12 }
 0x18b   : > { %5400 = vsyncadd (%p6339_p11), [#allocation18], 4294966272  ;;  %p6340_p6 = pmov %p6339_p11 }
 0x18d   : > { %5402 = dma.done.wait (%p6340_p6), [#allocation21], 2048   ;;  %p6341_p10 = pmov %p6340_p6 }
 0x18e   : > { %p6342_p8 = pmov %p6340_p6 }
 0x18f   : > { %5404 = vsyncadd (%p6341_p10), [#allocation21], 4294965248 }
 0x190   : > { %5406 = dma.done.wait (%p6342_p8), [#allocation24], 2048   ;;  %p6343_p1 = pmov %p6340_p6 }
 0x192   : > { %5408 = vsyncadd (%p6343_p1), [#allocation24], 4294965248  ;;  %p6344_p7 = pmov %p6343_p1 }
 0x193   : > { %p6345_p5 = pmov %p6343_p1 }
 0x194   : > { %5410 = dma.done.wait (%p6344_p7), [#allocation27], 1024  }
 0x195   : > { %5412 = vsyncadd (%p6345_p5), [#allocation27], 4294966272  ;;  %v4488_v0 = vld [vmem:[%s6004_s0 + $0x38] sm:$0xff]  ;;  %v4487_v2 = vld [vmem:[%s6004_s0 + $0x30] sm:$0xff]  ;;  %p1585_p13 = scmp.lt.s32.totalorder %s6337_s26, 1  ;;  %s6346_s13 = sld [smem:[#allocation43_spill]] }
 0x196   : > { %v4505_v1 = vld [vmem:[%s6012_s12 + $0x38] sm:$0xff]  ;;  %1727 = vmatpush.bf16.msra.mxu3 %v4488_v0  ;;  %v4504_v3 = vld [vmem:[%s6012_s12 + $0x30] sm:$0xff]  ;;  %v4486_v4 = vld [vmem:[%s6004_s0 + $0x28] sm:$0xff]  ;;  %vm2013_vm0 = vcmask 130048   ;;  %s6352_s27 = sld [smem:[#allocation53_spill]] }
 0x197   : > { %1900 = vmatpush.bf16.msra.mxu2 %v4505_v1  ;;  %v4503_v5 = vld [vmem:[%s6012_s12 + $0x28] sm:$0xff]  ;;  %v4496_v6 = vld [vmem:[%s6006_s19 + $0x38] sm:$0xff]  ;;  %v4495_v9 = vld [vmem:[%s6006_s19 + $0x30] sm:$0xff]  ;;  %s6072_s15 = scalar_select %p1585_p13, %s6337_s26, 1 }
 0x198   : > { %v1615_v7 = vld [vmem:[%s5997_s7] sm:$0xff]   ;;  %1811 = vmatpush.bf16.msra.mxu1 %v4496_v6  ;;  %v4485_v10 = vld [vmem:[%s6004_s0 + $0x20] sm:$0xff]  ;;  %v4494_v12 = vld [vmem:[%s6006_s19 + $0x28] sm:$0xff] }
 0x199   : > { %v1617_v8 = vunpack.c.l.bf16 %v1615_v7  ;;  %v4502_v11 = vld [vmem:[%s6012_s12 + $0x20] sm:$0xff]  ;;  %v1618_v13 = vunpack.c.h.bf16 %v1615_v7  ;;  %v4484_v14 = vld [vmem:[%s6004_s0 + $0x18] sm:$0xff]  ;;  %v4483_v17 = vld [vmem:[%s6004_s0 + $0x10] sm:$0xff]  ;;  %s4478_s11 = sshll.u32 %s6072_s15, 3 }
 0x19a   : > { %1728 = vmatpush.bf16.msra.mxu3 %v4487_v2  ;;  %v4501_v15 = vld [vmem:[%s6012_s12 + $0x18] sm:$0xff]  ;;  %v4493_v16 = vld [vmem:[%s6006_s19 + $0x20] sm:$0xff]  ;;  %v4500_v18 = vld [vmem:[%s6012_s12 + $0x10] sm:$0xff] }
 0x19b   : > { %1901 = vmatpush.bf16.msra.mxu2 %v4504_v3  ;;  %1619 = vxpose.xlu0.b32.start [1/2] (short) (narrow) %v1617_v8, 16  ;;  %v4482_v19 = vld [vmem:[%s6004_s0 + $0x8] sm:$0xff]  ;;  %v4481_v21 = vld [vmem:[%s6004_s0] sm:$0xff]  ;;  %s1589_s10 = scalar_lea.vmem %s6346_s13, %s4478_s11  ;;  %v4513_v23 = vld [vmem:[%s6014_s18 + $0x38] sm:$0xff]  ;;  %s6348_s0 = sld [smem:[#allocation48_spill]] }
 0x19c   : > { %1812 = vmatpush.bf16.msra.mxu1 %v4495_v9  ;;  %v4499_v20 = vld [vmem:[%s6012_s12 + $0x8] sm:$0xff]  ;;  %v4498_v22 = vld [vmem:[%s6012_s12] sm:$0xff]  ;;  %v4512_v26 = vld [vmem:[%s6014_s18 + $0x30] sm:$0xff] }
 0x19d   : > { %v4480_v24 = vld [vmem:[%s1589_s10] sm:$0xff]  ;;  %v4511_v27 = vld [vmem:[%s6014_s18 + $0x28] sm:$0xff]  ;;  %v4492_v29 = vld [vmem:[%s6006_s19 + $0x18] sm:$0xff]  ;;  %s6356_s10 = sld [smem:[#allocation59_spill]] }
 0x19e   : > { %1729 = vmatpush.bf16.msra.mxu3 %v4486_v4  ;;  %v4497_v25 = vld [vmem:[%s5990_s1] sm:$0xff]  ;;  %v4509_v30 = vld [vmem:[%s6014_s18 + $0x18] sm:$0xff]  ;;  %v4491_v31 = vld [vmem:[%s6006_s19 + $0x10] sm:$0xff]  ;;  %s6347_s1 = sld [smem:[#allocation45_spill]] }
 0x19f   : > { %1902 = vmatpush.bf16.msra.mxu2 %v4503_v5  ;;  %v4510_v28 = vld [vmem:[%s6014_s18 + $0x20] sm:$0xff]  ;;  %v4508_v32 = vld [vmem:[%s6014_s18 + $0x10] sm:$0xff]  ;;  %v4490_v33 = vld [vmem:[%s6006_s19 + $0x8] sm:$0xff] }
 0x1a0   : > { %1813 = vmatpush.bf16.msra.mxu1 %v4494_v12  ;;  %v4507_v34 = vld [vmem:[%s6014_s18 + $0x8] sm:$0xff]  ;;  %v4489_v35 = vld [vmem:[%s6006_s19] sm:$0xff]  ;;  %v4529_v37 = vld [vmem:[%s6021_s14 + $0x78] sm:$0xff]  ;;  %s6349_s19 = sld [smem:[#allocation47_spill]] }
 0x1a1   : > { %v4506_v36 = vld [vmem:[%s6014_s18] sm:$0xff]  ;;  %v4528_v38 = vld [vmem:[%s6021_s14 + $0x70] sm:$0xff]  ;;  %s1598_s28 = scalar_lea.vmem %s6348_s0, %s6072_s15  ;;  %s6350_s18 = sld [smem:[#allocation50_spill]]  ;;  %v4527_v59 = vld [vmem:[%s6021_s14 + $0x68] sm:$0xff] }
 0x1a2   : > { %1730 = vmatpush.bf16.msra.mxu3 %v4485_v10  ;;  %v1843_v40 = vld [vmem:[%s1598_s28] sm:$0x1]  ;;  %v4525_v61 = vld [vmem:[%s6021_s14 + $0x58] sm:$0xff]  ;;  %v4524_v62 = vld [vmem:[%s6021_s14 + $0x50] sm:$0xff]  ;;  %s6358_s0 = sld [smem:[#allocation61_spill]] }
 0x1a3   : > { %1903 = vmatpush.bf16.msra.mxu2 %v4502_v11  ;;  %1620 = vxpose.xlu0.b32.end [2/2] (short) (narrow) %v1618_v13, 16  ;;  %v1844_v42 = vunpack.c.l.bf16 %v1843_v40  ;;  %v4526_v60 = vld [vmem:[%s6021_s14 + $0x60] sm:$0xff]  ;;  %v4523_v63 = vld [vmem:[%s6021_s14 + $0x48] sm:$0xff]  ;;  %s6360_s28 = sld [smem:[#allocation62_spill]] }
 0x1a4   : > { %1814 = vmatpush.bf16.msra.mxu1 %v4493_v16  ;;  %s1592_s12 = scalar_lea.vmem %s6347_s1, %s6072_s15  ;;  %v4522_v0 = vld [vmem:[%s6021_s14 + $0x40] sm:$0xff]  ;;  %v4539_v40 = vld [vmem:[%s6023_s23 + $0x48] sm:$0xff]  ;;  %s6357_s1 = sld [smem:[#allocation65_spill]] }
 0x1a5   : > { %v1670_v39 = vld [vmem:[%s1592_s12] sm:$0x1]  ;;  %v1845_v46 = vperm.slane %v1844_v42, 0  ;;  %v4517_v42 = vld [vmem:[%s6021_s14 + $0x18] sm:$0xff]  ;;  %s6359_s12 = sld [smem:[#allocation66_spill]] }
 0x1a6   : > { %1731 = vmatpush.bf16.msra.mxu3 %v4484_v14  ;;  %v1671_v41 = vunpack.c.l.bf16 %v1670_v39  ;;  %s1595_s8 = scalar_lea.vmem %s6349_s19, %s6072_s15  ;;  %v4540_v39 = vld [vmem:[%s6023_s23 + $0x50] sm:$0xff]  ;;  %s6361_s19 = sld [smem:[#allocation68_spill]] }
 0x1a7   : > { %1904 = vmatpush.bf16.msra.mxu2 %v4501_v15  ;;  %v1760_v1 = vld [vmem:[%s1595_s8] sm:$0x1]  ;;  %s1601_s20 = scalar_lea.vmem %s6350_s18, %s6072_s15  ;;  %s3868_s18 = sshll.u32 %s5986_s16, 5 }
 0x1a8   : > { %1815 = vmatpush.bf16.msra.mxu1 %v4492_v29  ;;  %v1672_v45 = vperm.slane %v1671_v41, 0  ;;  %v1761_v2 = vunpack.c.l.bf16 %v1760_v1  ;;  %v1933_v4 = vld [vmem:[%s1601_s20] sm:$0x1]  ;;  %v4521_v29 = vld [vmem:[%s6021_s14 + $0x38] sm:$0xff]  ;;  %s1584_s20 = scalar_lea.vmem [#allocation29], %s5986_s16 }
 0x1a9   : > { %v1934_v6 = vunpack.c.l.bf16 %v1933_v4  ;;  %v4538_v41 = vld [vmem:[%s6023_s23 + $0x40] sm:$0xff] }
 0x1aa   : > { %1732 = vmatpush.bf16.msra.mxu3 %v4483_v17  ;;  %v1762_v5 = vperm.slane %v1761_v2, 0 }
 0x1ab   : > { %1905 = vmatpush.bf16.msra.mxu2 %v4500_v18  ;;  %v1935_v9 = vperm.slane %v1934_v6, 0 }
 0x1ac   : > { %1816 = vmatpush.bf16.msra.mxu1 %v4491_v31  ;;  %v4544_v31 = vld [vmem:[%s6023_s23 + $0x70] sm:$0xff]  ;;  %s3341_s8 = scalar_lea.hbm %s6361_s19, %s6337_s26 }
 0x1ae   : > { %1733 = vmatpush.bf16.msra.mxu3 %v4482_v19 }
 0x1af   : > { %1906 = vmatpush.bf16.msra.mxu2 %v4499_v20 }
 0x1b0   : > { %1817 = vmatpush.bf16.msra.mxu1 %v4490_v33  ;;  %v4520_v33 = vld [vmem:[%s6021_s14 + $0x30] sm:$0xff] }
 0x1b2   : > { %1734 = vmatpush.bf16.msra.mxu3 %v4481_v21 }
 0x1b3   : > { %1907 = vmatpush.bf16.msra.mxu2 %v4498_v22  ;;  %v6110_v22 = vld [vmem:[%s5997_s7] sm:$0xff]  ;;  %s6351_s7 = sld [smem:[#allocation52_spill]] }
 0x1b4   : > { %1818 = vmatpush.bf16.msra.mxu1 %v4489_v35  ;;  %v4519_v35 = vld [vmem:[%s6021_s14 + $0x28] sm:$0xff] }
 0x1b5   : > { %1735 = vmatmul.bf16.vlgmr.msra.gmra.mxu3 %v4480_v24 }
 0x1b6   : > { %1984 = vmatpush.bf16.msrb.mxu3 %v4513_v23  ;;  %1908 = vmatmul.bf16.vlgmr.msra.gmra.mxu2 %v4497_v25 }
 0x1b7   : > { %2190 = vmatpush.bf16.msrb.mxu2 %v4529_v37  ;;  %v4518_v37 = vld [vmem:[%s6021_s14 + $0x20] sm:$0xff] }
 0x1b8   : > { %2176 = vmatpush.bf16.msrb.mxu1 %v4521_v29 }
 0x1ba   : > { %1985 = vmatpush.bf16.msrb.mxu3 %v4512_v26  ;;  %v4545_v26 = vld [vmem:[%s6023_s23 + $0x78] sm:$0xff] }
 0x1bb   : > { %2191 = vmatpush.bf16.msrb.mxu2 %v4528_v38  ;;  %v4541_v38 = vld [vmem:[%s6023_s23 + $0x58] sm:$0xff] }
 0x1bc   : > { %2177 = vmatpush.bf16.msrb.mxu1 %v4520_v33 }
 0x1be   : > { %1986 = vmatpush.bf16.msrb.mxu3 %v4511_v27 }
 0x1bf   : > { %2192 = vmatpush.bf16.msrb.mxu2 %v4527_v59 }
 0x1c0   : > { %2178 = vmatpush.bf16.msrb.mxu1 %v4519_v35  ;;  %v4576_v35 = vld [vmem:[%s6031_s30 + $0x70] sm:$0xff] }
 0x1c2   : > { %1987 = vmatpush.bf16.msrb.mxu3 %v4510_v28 }
 0x1c3   : > { %2193 = vmatpush.bf16.msrb.mxu2 %v4526_v60 }
 0x1c4   : > { %2179 = vmatpush.bf16.msrb.mxu1 %v4518_v37 }
 0x1c6   : > { %1988 = vmatpush.bf16.msrb.mxu3 %v4509_v30 }
 0x1c7   : > { %2194 = vmatpush.bf16.msrb.mxu2 %v4525_v61 }
 0x1c8   : > { %2180 = vmatpush.bf16.msrb.mxu1 %v4517_v42 }
 0x1ca   : > { %1989 = vmatpush.bf16.msrb.mxu3 %v4508_v32  ;;  %v4537_v32 = vld [vmem:[%s6023_s23 + $0x38] sm:$0xff] }
 0x1cb   : > { %2195 = vmatpush.bf16.msrb.mxu2 %v4524_v62 }
 0x1ce   : > { %1990 = vmatpush.bf16.msrb.mxu3 %v4507_v34  ;;  %v4543_v34 = vld [vmem:[%s6023_s23 + $0x68] sm:$0xff] }
 0x1cf   : > { %2196 = vmatpush.bf16.msrb.mxu2 %v4523_v63 }
 0x1d2   : > { %1991 = vmatpush.bf16.msrb.mxu3 %v4506_v36  ;;  %v4542_v36 = vld [vmem:[%s6023_s23 + $0x60] sm:$0xff] }
 0x1d3   : > { %2197 = vmatpush.bf16.msrb.mxu2 %v4522_v0 }
 0x238   : > { %v1736_v43 = vpop.f32.mrf.mxu3 }
 0x239   : > { %v1909_v44 = vpop.f32.mrf.mxu2  ;;  %v1737_v47 = vadd.f32 %v1736_v43, %v1672_v45  ;;  %v4536_v43 = vld [vmem:[%s6023_s23 + $0x30] sm:$0xff] }
 0x23a   : > { %v1910_v48 = vadd.f32 %v1909_v44, %v1845_v46  ;;  %v4516_v44 = vld [vmem:[%s6021_s14 + $0x10] sm:$0xff] }
 0x23b   : > { %v1741_v53 = vmax.f32 %v1737_v47, 0.0  ;;  %2181 = vmatpush.bf16.msrb.mxu1 %v4516_v44  ;;  %v4534_v47 = vld [vmem:[%s6023_s23 + $0x20] sm:$0xff] }
 0x23c   : > { %v1914_v54 = vmax.f32 %v1910_v48, 0.0  ;;  %v4514_v48 = vld [vmem:[%s6021_s14] sm:$0xff] }
 0x23d   : > { %v4574_v44 = vld [vmem:[%s6031_s30 + $0x60] sm:$0xff] }
 0x23f   : > { %v1635_v15 = vpop.trf.xlu0 }
 0x240   : > { %v1738_v49 = vpop.f32.mrf.mxu3 }
 0x241   : > { %v1911_v50 = vpop.f32.mrf.mxu2  ;;  %v1739_v51 = vadd.f32 %v1738_v49, %v1672_v45  ;;  %v4535_v45 = vld [vmem:[%s6023_s23 + $0x28] sm:$0xff]  ;;  %v4533_v49 = vld [vmem:[%s6023_s23 + $0x18] sm:$0xff] }
 0x242   : > { %v1912_v52 = vadd.f32 %v1911_v50, %v1845_v46  ;;  %v4515_v46 = vld [vmem:[%s6021_s14 + $0x8] sm:$0xff]  ;;  %v4532_v50 = vld [vmem:[%s6023_s23 + $0x10] sm:$0xff]  ;;  %s1604_s14 = scalar_lea.vmem %s6351_s7, %s6072_s15 }
 0x243   : > { %v1742_v55 = vmax.f32 %v1739_v51, 0.0  ;;  %2182 = vmatpush.bf16.msrb.mxu1 %v4515_v46  ;;  %v4531_v51 = vld [vmem:[%s6023_s23 + $0x8] sm:$0xff]  ;;  %v4560_v46 = vld [vmem:[%s6029_s22 + $0x70] sm:$0xff] }
 0x244   : > { %v1915_v56 = vmax.f32 %v1912_v52, 0.0  ;;  %v4530_v52 = vld [vmem:[%s6023_s23] sm:$0xff]  ;;  %s1607_s23 = scalar_lea.vmem %s6352_s27, %s6072_s15  ;;  %s3343_s27 = sshll.u32 %s1584_s20, 4  ;;  %s3344_s27 = int_to_ptr.vmem [resolvable:$true] %s3343_s27 }
 0x245   : > { %v1743_v58 = vpack.c.bf16 %v1742_v55, %v1741_v53 }
 0x246   : > { %v1916_v57 = vpack.c.bf16 %v1915_v56, %v1914_v54 }
 0x247   : > { %1819 = vmatmul.bf16.vlgmr.msra.gmra.mxu1 %v1743_v58  ;;  %v1636_v28 = vpop.trf.xlu0 }
 0x248   : > { %1992 = vmatmul.bf16.vlgmr.msrb.gmra.mxu3 %v1916_v57  ;;  %v6116_v30 = vpack.c.bf16 %v1636_v28, %v1635_v15  ;;  %2183 = vmatpush.bf16.msrb.mxu1 %v4514_v48  ;;  %v4577_v28 = vld [vmem:[%s6031_s30 + $0x78] sm:$0xff] }
 0x249   : > { %v4553_v48 = vld [vmem:[%s6029_s22 + $0x38] sm:$0xff] }
 0x24a   : > { %2561 = vmatpush.bf16.msra.mxu2 %v4553_v48  ;;  %v4616_v48 = vld [vmem:[#allocation25 + $0x30] sm:$0xff] }
 0x2c4   : > { %v1820_v3 = vpop.f32.mrf.mxu1 }
 0x2c5   : > { %v1821_v7 = vadd.f32 %v1820_v3, %v1762_v5  ;;  %v2077_v3 = vld [vmem:[%s1604_s14] sm:$0x1]  ;;  %s3345_s14 = sshll.u32 %s3341_s8, 4  ;;  %s3346_s14 = int_to_ptr.hbm [resolvable:$true] %s3345_s14 }
 0x2c6   : > { %v2078_v4 = vunpack.c.l.bf16 %v2077_v3  ;;  %v4562_v3 = vld [vmem:[%s6031_s30] sm:$0xff] }
 0x2c7   : > { %v1998_v11 = vpack.c.bf16 %v1821_v7, %v1821_v7 }
 0x2c9   : > { %v2009_v16 = vunpack.c.l.b16 %v1998_v11 }
 0x2cb   : > { %v1993_v8 = vpop.f32.mrf.mxu3 }
 0x2cc   : > { %v1822_v10 = vpop.f32.mrf.mxu1  ;;  %v1994_v13 = vadd.f32 %v1993_v8, %v1935_v9 }
 0x2cd   : > { %v1823_v12 = vadd.f32 %v1822_v10, %v1762_v5  ;;  %v2079_v5 = vperm.slane %v2078_v4, 0  ;;  %v4548_v4 = vld [vmem:[%s6029_s22 + $0x10] sm:$0xff] }
 0x2ce   : > { %v2000_v19 = vpack.c.bf16 %v1994_v13, %v1994_v13 }
 0x2cf   : > { %v1999_v14 = vpack.c.bf16 %v1823_v12, %v1823_v12 }
 0x2d0   : > { %v2041_v24 = vunpack.c.l.b16 %v2000_v19 }
 0x2d1   : > { %v2010_v17 = vunpack.c.l.b16 %v1999_v14 }
 0x2d3   : > { %v1995_v18 = vpop.f32.mrf.mxu3  ;;  %v2011_v21 = vpack.c.b16 %v2010_v17, %v2009_v16 }
 0x2d4   : > { %v1996_v20 = vadd.f32 %v1995_v18, %v1935_v9  ;;  %v2263_v9 = vld [vmem:[%s1607_s23] sm:$0x1]  ;;  %s6196_s23 = scalar_lea.vmem [#allocation28], %s3868_s18 }
 0x2d5   : > { %2024 = vmatpush.bf16.msra.mxu0 %v2011_v21  ;;  %v2264_v11 = vunpack.c.l.bf16 %v2263_v9 }
 0x2d6   : > { %v2001_v23 = vpack.c.bf16 %v1996_v20, %v1996_v20 }
 0x2d7   : > { %v2265_v15 = vperm.slane %v2264_v11, 0 }
 0x2d8   : > { %v2042_v25 = vunpack.c.l.b16 %v2001_v23  ;;  %4011 = vmatmul.msk.bf16.vlgmr.msra.gmra.mxu0 %vm2013_vm0, %v6110_v22 }
 0x2d9   : > { %2362 = vmatpush.bf16.msrb.mxu0 %v4537_v32 }
 0x2da   : > { %v2043_v27 = vpack.c.b16 %v2042_v25, %v2041_v24 }
 0x2dc   : > { %2198 = vmatmul.bf16.vlgmr.msrb.gmra.mxu2 %v2043_v27  ;;  %2216 = vmatpush.bf16.msra.mxu3 %v2043_v27 }
 0x2dd   : > { %2363 = vmatpush.bf16.msrb.mxu0 %v4536_v43  ;;  %v4561_v43 = vld [vmem:[%s6029_s22 + $0x78] sm:$0xff] }
 0x2df   : > { %4076 = vmatmul.msk.bf16.vlgmr.msra.gmra.mxu3 %vm2013_vm0, %v6116_v30 }
 0x2e0   : > { %2376 = vmatpush.bf16.msrb.mxu3 %v4545_v26 }
 0x2e1   : > { %2364 = vmatpush.bf16.msrb.mxu0 %v4535_v45 }
 0x2e4   : > { %2377 = vmatpush.bf16.msrb.mxu3 %v4544_v31 }
 0x2e5   : > { %2365 = vmatpush.bf16.msrb.mxu0 %v4534_v47  ;;  %v4573_v47 = vld [vmem:[%s6031_s30 + $0x58] sm:$0xff] }
 0x2e8   : > { %2378 = vmatpush.bf16.msrb.mxu3 %v4543_v34 }
 0x2e9   : > { %2366 = vmatpush.bf16.msrb.mxu0 %v4533_v49  ;;  %v4568_v49 = vld [vmem:[%s6031_s30 + $0x30] sm:$0xff] }
 0x2ec   : > { %2379 = vmatpush.bf16.msrb.mxu3 %v4542_v36 }
 0x2ed   : > { %2367 = vmatpush.bf16.msrb.mxu0 %v4532_v50  ;;  %v4552_v50 = vld [vmem:[%s6029_s22 + $0x30] sm:$0xff] }
 0x2ee   : > { %2562 = vmatpush.bf16.msra.mxu2 %v4552_v50  ;;  %v4592_v50 = vld [vmem:[#allocation20 + $0x30] sm:$0xff] }
 0x2f0   : > { %2380 = vmatpush.bf16.msrb.mxu3 %v4541_v38 }
 0x2f1   : > { %2368 = vmatpush.bf16.msrb.mxu0 %v4531_v51  ;;  %v4559_v51 = vld [vmem:[%s6029_s22 + $0x68] sm:$0xff] }
 0x2f4   : > { %2381 = vmatpush.bf16.msrb.mxu3 %v4540_v39  ;;  %v4575_v39 = vld [vmem:[%s6031_s30 + $0x68] sm:$0xff] }
 0x2f5   : > { %2369 = vmatpush.bf16.msrb.mxu0 %v4530_v52  ;;  %v4572_v52 = vld [vmem:[%s6031_s30 + $0x50] sm:$0xff] }
 0x2f8   : > { %2382 = vmatpush.bf16.msrb.mxu3 %v4539_v40 }
 0x2fc   : > { %2383 = vmatpush.bf16.msrb.mxu3 %v4538_v41 }
 0x2ff   : > { %2384 = vmatmul.bf16.vlgmr.msrb.gmra.mxu3 %v2011_v21 }
 0x355   : > { %v2026_v53 = vpop.f32.mrf.mxu0 }
 0x356   : > { %v2031_v54 = vpack.c.bf16 %v2026_v53, %v2026_v53  ;;  %v4567_v53 = vld [vmem:[%s6031_s30 + $0x28] sm:$0xff] }
 0x358   : > { %v2035_v57 = vunpack.c.l.b16 %v2031_v54  ;;  %v4558_v54 = vld [vmem:[%s6029_s22 + $0x60] sm:$0xff] }
 0x35d   : > { %v2028_v55 = vpop.f32.mrf.mxu0 }
 0x35e   : > { %v2032_v56 = vpack.c.bf16 %v2028_v55, %v2028_v55  ;;  %v4571_v55 = vld [vmem:[%s6031_s30 + $0x48] sm:$0xff] }
 0x35f   : > { %v2199_v6 = vpop.f32.mrf.mxu2 }
 0x360   : > { %v2036_v58 = vunpack.c.l.b16 %v2032_v56  ;;  %v4557_v56 = vld [vmem:[%s6029_s22 + $0x58] sm:$0xff] }
 0x362   : > { %v2218_v59 = vpop.f32.mrf.mxu3  ;;  %v2037_v60 = vpack.c.b16 %v2036_v58, %v2035_v57  ;;  %v4570_v57 = vld [vmem:[%s6031_s30 + $0x40] sm:$0xff]  ;;  %v4556_v58 = vld [vmem:[%s6029_s22 + $0x50] sm:$0xff] }
 0x363   : > { %v2223_v61 = vpack.c.bf16 %v2218_v59, %v2218_v59  ;;  %v4555_v59 = vld [vmem:[%s6029_s22 + $0x48] sm:$0xff] }
 0x364   : > { %2184 = vmatmul.bf16.vlgmr.msrb.gmra.mxu1 %v2037_v60  ;;  %v4554_v60 = vld [vmem:[%s6029_s22 + $0x40] sm:$0xff] }
 0x365   : > { %v2227_v0 = vunpack.c.l.b16 %v2223_v61  ;;  %v4565_v61 = vld [vmem:[%s6031_s30 + $0x18] sm:$0xff] }
 0x367   : > { %v2201_v16 = vpop.f32.mrf.mxu2 }
 0x36a   : > { %v2220_v62 = vpop.f32.mrf.mxu3 }
 0x36b   : > { %v2224_v63 = vpack.c.bf16 %v2220_v62, %v2220_v62  ;;  %v4551_v62 = vld [vmem:[%s6029_s22 + $0x28] sm:$0xff] }
 0x36c   : > { %2563 = vmatpush.bf16.msra.mxu2 %v4551_v62 }
 0x36d   : > { %v2228_v1 = vunpack.c.l.b16 %v2224_v63  ;;  %v4564_v63 = vld [vmem:[%s6031_s30 + $0x10] sm:$0xff] }
 0x36f   : > { %v2229_v2 = vpack.c.b16 %v2228_v1, %v2227_v0  ;;  %v4550_v0 = vld [vmem:[%s6029_s22 + $0x20] sm:$0xff]  ;;  %v4563_v1 = vld [vmem:[%s6031_s30 + $0x8] sm:$0xff] }
 0x370   : > { %2564 = vmatpush.bf16.msra.mxu2 %v4550_v0  ;;  %v4614_v0 = vld [vmem:[#allocation25 + $0x20] sm:$0xff] }
 0x371   : > { %2370 = vmatmul.bf16.vlgmr.msrb.gmra.mxu0 %v2229_v2  ;;  %v4549_v2 = vld [vmem:[%s6029_s22 + $0x18] sm:$0xff] }
 0x374   : > { %2565 = vmatpush.bf16.msra.mxu2 %v4549_v2 }
 0x378   : > { %2566 = vmatpush.bf16.msra.mxu2 %v4548_v4 }
 0x382   : > { %v2385_v18 = vpop.f32.mrf.mxu3 }
 0x38a   : > { %v2387_v34 = vpop.f32.mrf.mxu3 }
 0x3e1   : > { %v2185_v7 = vpop.f32.mrf.mxu1 }
 0x3e2   : > { %v2186_v8 = vadd.f32 %v2185_v7, %v2079_v5 }
 0x3e4   : > { %v2200_v10 = vadd.f32 %v2199_v6, %v2186_v8  ;;  %v4546_v6 = vld [vmem:[%s6029_s22] sm:$0xff] }
 0x3e6   : > { %v2204_v13 = vmax.f32 %v2200_v10, 0.0 }
 0x3e8   : > { %v2394_v20 = vpack.c.bf16 %v2204_v13, %v2204_v13 }
 0x3e9   : > { %v2187_v12 = vpop.f32.mrf.mxu1 }
 0x3ea   : > { %v2188_v14 = vadd.f32 %v2187_v12, %v2079_v5  ;;  %v2426_v25 = vunpack.c.l.b16 %v2394_v20  ;;  %v4547_v5 = vld [vmem:[%s6029_s22 + $0x8] sm:$0xff]  ;;  %s6353_s22 = sld [smem:[#allocation57_spill]] }
 0x3eb   : > { %2567 = vmatpush.bf16.msra.mxu2 %v4547_v5 }
 0x3ec   : > { %v2202_v17 = vadd.f32 %v2201_v16, %v2188_v14 }
 0x3ee   : > { %v2371_v19 = vpop.f32.mrf.mxu0  ;;  %v2205_v21 = vmax.f32 %v2202_v17, 0.0  ;;  %v4608_v17 = vld [vmem:[#allocation23 + $0x30] sm:$0xff] }
 0x3ef   : > { %v2372_v23 = vadd.f32 %v2371_v19, %v2265_v15  ;;  %2568 = vmatpush.bf16.msra.mxu2 %v4546_v6 }
 0x3f0   : > { %v2395_v24 = vpack.c.bf16 %v2205_v21, %v2205_v21  ;;  %s1613_s13 = scalar_lea.vmem %s6353_s22, %s6072_s15  ;;  %s3316_s22 = scalar_lea.sflag [#allocation30], %s5986_s16 }
 0x3f1   : > { %v2386_v27 = vadd.f32 %v2385_v18, %v2372_v23  ;;  %v4607_v23 = vld [vmem:[#allocation23 + $0x28] sm:$0xff] }
 0x3f2   : > { %v2427_v26 = vunpack.c.l.b16 %v2395_v24 }
 0x3f3   : > { %v2390_v32 = vmax.f32 %v2386_v27, 0.0  ;;  %v4584_v27 = vld [vmem:[#allocation19 + $0x30] sm:$0xff] }
 0x3f4   : > { %v2428_v29 = vpack.c.b16 %v2427_v26, %v2426_v25  ;;  %v4585_v25 = vld [vmem:[#allocation19 + $0x38] sm:$0xff]  ;;  %v4606_v26 = vld [vmem:[#allocation23 + $0x20] sm:$0xff] }
 0x3f5   : > { %v2392_v37 = vpack.c.bf16 %v2390_v32, %v2390_v32  ;;  %2853 = vmatpush.bf16.msrb.mxu2 %v4585_v25  ;;  %v4582_v32 = vld [vmem:[#allocation19 + $0x20] sm:$0xff] }
 0x3f6   : > { %v2373_v31 = vpop.f32.mrf.mxu0  ;;  %2598 = vmatpush.bf16.msra.mxu1 %v2428_v29 }
 0x3f7   : > { %v2374_v33 = vadd.f32 %v2373_v31, %v2265_v15  ;;  %v2398_v41 = vunpack.c.l.b16 %v2392_v37  ;;  %v4609_v15 = vld [vmem:[#allocation23 + $0x38] sm:$0xff]  ;;  %v4604_v31 = vld [vmem:[#allocation23 + $0x10] sm:$0xff]  ;;  %v2645_v37 = vld [vmem:[%s1613_s13] sm:$0x1] }
 0x3f9   : > { %v2388_v36 = vadd.f32 %v2387_v34, %v2374_v33  ;;  %4206 = vmatmul.msk.bf16.vlgmr.msra.gmra.mxu1 %vm2013_vm0, %v6116_v30  ;;  %v4569_v30 = vld [vmem:[%s6031_s30 + $0x38] sm:$0xff]  ;;  %2854 = vmatpush.bf16.msrb.mxu2 %v4584_v27  ;;  %v4603_v33 = vld [vmem:[#allocation23 + $0x8] sm:$0xff]  ;;  %v4612_v27 = vld [vmem:[#allocation25 + $0x10] sm:$0xff] }
 0x3fa   : > { %2758 = vmatpush.bf16.msrb.mxu1 %v4577_v28  ;;  %2744 = vmatpush.bf16.msra.mxu3 %v4569_v30  ;;  %v4605_v28 = vld [vmem:[#allocation23 + $0x18] sm:$0xff] }
 0x3fb   : > { %v2391_v38 = vmax.f32 %v2388_v36, 0.0  ;;  %v4581_v34 = vld [vmem:[#allocation19 + $0x18] sm:$0xff]  ;;  %v4580_v36 = vld [vmem:[#allocation19 + $0x10] sm:$0xff] }
 0x3fc   : > { %v4617_v30 = vld [vmem:[#allocation25 + $0x38] sm:$0xff] }
 0x3fd   : > { %v2393_v40 = vpack.c.bf16 %v2391_v38, %v2391_v38  ;;  %v4579_v38 = vld [vmem:[#allocation19 + $0x8] sm:$0xff] }
 0x3fe   : > { %2759 = vmatpush.bf16.msrb.mxu1 %v4576_v35  ;;  %2745 = vmatpush.bf16.msra.mxu3 %v4568_v49  ;;  %v4602_v35 = vld [vmem:[#allocation23] sm:$0xff] }
 0x3ff   : > { %v2399_v42 = vunpack.c.l.b16 %v2393_v40  ;;  %v4578_v40 = vld [vmem:[#allocation19] sm:$0xff] }
 0x401   : > { %v2400_v45 = vpack.c.b16 %v2399_v42, %v2398_v41 }
 0x402   : > { %2760 = vmatpush.bf16.msrb.mxu1 %v4575_v39  ;;  %2746 = vmatpush.bf16.msra.mxu3 %v4567_v53  ;;  %v2646_v39 = vunpack.c.l.bf16 %v2645_v37  ;;  %v4625_v37 = vld [vmem:[#allocation26 + $0x38] sm:$0xff] }
 0x403   : > { %2409 = vmatpush.bf16.msra.mxu0 %v2400_v45 }
 0x404   : > { %v2647_v41 = vperm.slane %v2646_v39, 0  ;;  %v4600_v39 = vld [vmem:[#allocation22 + $0x30] sm:$0xff] }
 0x406   : > { %2761 = vmatpush.bf16.msrb.mxu1 %v4574_v44  ;;  %4141 = vmatmul.msk.bf16.vlgmr.msra.gmra.mxu0 %vm2013_vm0, %v6110_v22  ;;  %v4566_v22 = vld [vmem:[%s6031_s30 + $0x20] sm:$0xff]  ;;  %s6354_s30 = sld [smem:[#allocation55_spill]] }
 0x407   : > { %2575 = vmatpush.bf16.msrb.mxu0 %v4561_v43  ;;  %2747 = vmatpush.bf16.msra.mxu3 %v4566_v22  ;;  %v4615_v22 = vld [vmem:[#allocation25 + $0x28] sm:$0xff] }
 0x40a   : > { %2762 = vmatpush.bf16.msrb.mxu1 %v4573_v47  ;;  %v4593_v47 = vld [vmem:[#allocation20 + $0x38] sm:$0xff] }
 0x40b   : > { %2576 = vmatpush.bf16.msrb.mxu0 %v4560_v46  ;;  %2748 = vmatpush.bf16.msra.mxu3 %v4565_v61 }
 0x40c   : > { %s1610_s11 = scalar_lea.vmem %s6354_s30, %s6072_s15  ;;  %s6355_s15 = sld [smem:[#allocation64_spill]] }
 0x40d   : > { %v2462_v46 = vld [vmem:[%s1610_s11] sm:$0x1]  ;;  %s5315_s30 = sshra.s32 %s3346_s14, 4  ;;  %s5321_s11 = scalar_lea.hbm %s6361_s19, 2  ;;  %s5316_s30 = int_to_ptr.hbm [resolvable:$true] %s5315_s30 }
 0x40e   : > { %2763 = vmatpush.bf16.msrb.mxu1 %v4572_v52  ;;  %v2463_v53 = vunpack.c.l.bf16 %v2462_v46  ;;  %v4622_v46 = vld [vmem:[#allocation26 + $0x20] sm:$0xff]  ;;  %s5317_s13 = scalar_lea.hbm %s5316_s30, 1  ;;  %p5322_p12 = scmp.lt.s32.totalorder %s5316_s30, %s6361_s19 }
 0x40f   : > { %2577 = vmatpush.bf16.msrb.mxu0 %v4559_v51  ;;  %2749 = vmatpush.bf16.msra.mxu3 %v4564_v63  ;;  %p5318_p0 = scmp.ne.s32.totalorder %s5316_s30, %s5317_s13  ;;  %p5323_p11 = scmp.lt.s32.totalorder %s5321_s11, %s5317_s13 }
 0x410   : > { %v2464_v61 = vperm.slane %v2463_v53, 0 }
 0x411   : > { %p5319_p2 = pnand %p5318_p0, %p5764_p9  ;;  %p5324_p6 = por %p5323_p11, %p5322_p12 }
 0x412   : > { %2764 = vmatpush.bf16.msrb.mxu1 %v4571_v55 }
 0x413   : > { %2578 = vmatpush.bf16.msrb.mxu0 %v4558_v54  ;;  %2750 = vmatpush.bf16.msra.mxu3 %v4563_v1  ;;  %p5320_p4 = pneg %p5319_p2 }
 0x415   : > { %p5325_p10 = pnand %p5324_p6, %p5320_p4 }
 0x416   : > { %2765 = vmatpush.bf16.msrb.mxu1 %v4570_v57 }
 0x417   : > { %2579 = vmatpush.bf16.msrb.mxu0 %v4557_v56  ;;  %2751 = vmatpush.bf16.msra.mxu3 %v4562_v3 }
 0x419   : > { %2766 = vmatmul.bf16.vlgmr.msrb.gmra.mxu1 %v2400_v45 }
 0x41a   : > { %3106 = vmatpush.bf16.msra.mxu1 %v4609_v15 }
 0x41b   : > { %2580 = vmatpush.bf16.msrb.mxu0 %v4556_v58  ;;  %v4591_v58 = vld [vmem:[#allocation20 + $0x28] sm:$0xff] }
 0x41e   : > { %3107 = vmatpush.bf16.msra.mxu1 %v4608_v17 }
 0x41f   : > { %2581 = vmatpush.bf16.msrb.mxu0 %v4555_v59 }
 0x422   : > { %3108 = vmatpush.bf16.msra.mxu1 %v4607_v23 }
 0x423   : > { %2582 = vmatpush.bf16.msrb.mxu0 %v4554_v60 }
 0x426   : > { %2583 = vmatmul.bf16.vlgmr.msrb.gmra.mxu0 %v2428_v29  ;;  %3109 = vmatpush.bf16.msra.mxu1 %v4606_v26  ;;  %v4583_v29 = vld [vmem:[#allocation19 + $0x28] sm:$0xff] }
 0x427   : > { %2855 = vmatpush.bf16.msrb.mxu2 %v4583_v29  ;;  %2933 = vmatpush.bf16.msra.mxu0 %v4593_v47  ;;  %v4611_v29 = vld [vmem:[#allocation25 + $0x8] sm:$0xff] }
 0x42a   : > { %3110 = vmatpush.bf16.msra.mxu1 %v4605_v28  ;;  %v4590_v28 = vld [vmem:[#allocation20 + $0x20] sm:$0xff] }
 0x42b   : > { %2856 = vmatpush.bf16.msrb.mxu2 %v4582_v32  ;;  %2934 = vmatpush.bf16.msra.mxu0 %v4592_v50  ;;  %v4610_v32 = vld [vmem:[#allocation25] sm:$0xff] }
 0x42e   : > { %3111 = vmatpush.bf16.msra.mxu1 %v4604_v31  ;;  %v4589_v31 = vld [vmem:[#allocation20 + $0x18] sm:$0xff] }
 0x42f   : > { %2857 = vmatpush.bf16.msrb.mxu2 %v4581_v34  ;;  %2935 = vmatpush.bf16.msra.mxu0 %v4591_v58  ;;  %v4587_v34 = vld [vmem:[#allocation20 + $0x8] sm:$0xff] }
 0x432   : > { %3112 = vmatpush.bf16.msra.mxu1 %v4603_v33  ;;  %v4588_v33 = vld [vmem:[#allocation20 + $0x10] sm:$0xff] }
 0x433   : > { %2858 = vmatpush.bf16.msrb.mxu2 %v4580_v36  ;;  %2936 = vmatpush.bf16.msra.mxu0 %v4590_v28  ;;  %v4601_v36 = vld [vmem:[#allocation22 + $0x38] sm:$0xff] }
 0x434   : > { %3014 = vmatpush.bf16.msrb.mxu3 %v4601_v36 }
 0x436   : > { %3113 = vmatpush.bf16.msra.mxu1 %v4602_v35  ;;  %v4586_v35 = vld [vmem:[#allocation20] sm:$0xff] }
 0x437   : > { %2859 = vmatpush.bf16.msrb.mxu2 %v4579_v38  ;;  %2937 = vmatpush.bf16.msra.mxu0 %v4589_v31  ;;  %v3055_v38 = vld [vmem:[%s6355_s15] sm:$0x1] }
 0x438   : > { %3015 = vmatpush.bf16.msrb.mxu3 %v4600_v39  ;;  %v3235_v31 = vld [vmem:[%s6359_s12] sm:$0x1] }
 0x43b   : > { %2860 = vmatpush.bf16.msrb.mxu2 %v4578_v40  ;;  %2938 = vmatpush.bf16.msra.mxu0 %v4588_v33  ;;  %v4624_v40 = vld [vmem:[#allocation26 + $0x30] sm:$0xff]  ;;  %v2964_v33 = vld [vmem:[%s6360_s28] sm:$0x1] }
 0x43f   : > { %2939 = vmatpush.bf16.msra.mxu0 %v4587_v34 }
 0x443   : > { %2940 = vmatpush.bf16.msra.mxu0 %v4586_v35  ;;  %v2965_v35 = vunpack.c.l.bf16 %v2964_v33 }
 0x447   : > { %3286 = vmatpush.bf16.msrb.mxu0 %v4625_v37 }
 0x44b   : > { %3287 = vmatpush.bf16.msrb.mxu0 %v4624_v40 }
 0x476   : > { %v2600_v7 = vpop.f32.mrf.mxu1 }
 0x477   : > { %v2605_v8 = vpack.c.bf16 %v2600_v7, %v2600_v7  ;;  %v4613_v7 = vld [vmem:[#allocation25 + $0x18] sm:$0xff] }
 0x479   : > { %v2609_v11 = vunpack.c.l.b16 %v2605_v8 }
 0x47e   : > { %v2602_v9 = vpop.f32.mrf.mxu1 }
 0x47f   : > { %v2606_v10 = vpack.c.bf16 %v2602_v9, %v2602_v9 }
 0x481   : > { %v2610_v12 = vunpack.c.l.b16 %v2606_v10 }
 0x483   : > { %v2411_v13 = vpop.f32.mrf.mxu0  ;;  %v2611_v14 = vpack.c.b16 %v2610_v12, %v2609_v11 }
 0x484   : > { %v2416_v16 = vpack.c.bf16 %v2411_v13, %v2411_v13 }
 0x485   : > { %2752 = vmatmul.bf16.vlgmr.msra.gmra.mxu3 %v2611_v14 }
 0x486   : > { %v2420_v20 = vunpack.c.l.b16 %v2416_v16 }
 0x48b   : > { %v2413_v18 = vpop.f32.mrf.mxu0 }
 0x48c   : > { %v2417_v19 = vpack.c.bf16 %v2413_v18, %v2413_v18 }
 0x48e   : > { %v2421_v21 = vunpack.c.l.b16 %v2417_v19 }
 0x490   : > { %v2422_v24 = vpack.c.b16 %v2421_v21, %v2420_v20 }
 0x492   : > { %2569 = vmatmul.bf16.vlgmr.msra.gmra.mxu2 %v2422_v24 }
 0x493   : > { %3194 = vmatpush.bf16.msra.mxu2 %v4617_v30  ;;  %v4598_v30 = vld [vmem:[#allocation22 + $0x20] sm:$0xff] }
 0x496   : > { %v2767_v42 = vpop.f32.mrf.mxu1 }
 0x497   : > { %3195 = vmatpush.bf16.msra.mxu2 %v4616_v48 }
 0x49b   : > { %3196 = vmatpush.bf16.msra.mxu2 %v4615_v22 }
 0x49e   : > { %v2769_v54 = vpop.f32.mrf.mxu1 }
 0x49f   : > { %3197 = vmatpush.bf16.msra.mxu2 %v4614_v0  ;;  %v4595_v0 = vld [vmem:[#allocation22 + $0x8] sm:$0xff] }
 0x4a3   : > { %v2584_v56 = vpop.f32.mrf.mxu0  ;;  %3198 = vmatpush.bf16.msra.mxu2 %v4613_v7 }
 0x4a7   : > { %3199 = vmatpush.bf16.msra.mxu2 %v4612_v27 }
 0x4ab   : > { %v2586_v12 = vpop.f32.mrf.mxu0  ;;  %3200 = vmatpush.bf16.msra.mxu2 %v4611_v29 }
 0x4af   : > { %3201 = vmatpush.bf16.msra.mxu2 %v4610_v32  ;;  %v3236_v32 = vunpack.c.l.bf16 %v3235_v31 }
 0x4b1   : > { %v3237_v34 = vperm.slane %v3236_v32, 0 }
 0x508   : > { %v2753_v43 = vpop.f32.mrf.mxu3 }
 0x509   : > { %v2754_v44 = vadd.f32 %v2753_v43, %v2647_v41  ;;  %v4599_v43 = vld [vmem:[#allocation22 + $0x28] sm:$0xff] }
 0x50a   : > { %3016 = vmatpush.bf16.msrb.mxu3 %v4599_v43 }
 0x50b   : > { %v2768_v45 = vadd.f32 %v2767_v42, %v2754_v44  ;;  %v3056_v42 = vunpack.c.l.bf16 %v3055_v38  ;;  %v4623_v44 = vld [vmem:[#allocation26 + $0x28] sm:$0xff] }
 0x50c   : > { %3288 = vmatpush.bf16.msrb.mxu0 %v4623_v44 }
 0x50d   : > { %v2772_v51 = vmax.f32 %v2768_v45, 0.0  ;;  %v3057_v45 = vperm.slane %v3056_v42, 0 }
 0x50e   : > { %3017 = vmatpush.bf16.msrb.mxu3 %v4598_v30 }
 0x50f   : > { %v2774_v59 = vpack.c.bf16 %v2772_v51, %v2772_v51 }
 0x510   : > { %v2755_v49 = vpop.f32.mrf.mxu3  ;;  %3289 = vmatpush.bf16.msrb.mxu0 %v4622_v46 }
 0x511   : > { %v2756_v52 = vadd.f32 %v2755_v49, %v2647_v41  ;;  %v3029_v1 = vunpack.c.l.b16 %v2774_v59 }
 0x513   : > { %v2770_v55 = vadd.f32 %v2769_v54, %v2756_v52  ;;  %v2803_v52 = vld [vmem:[%s6356_s10] sm:$0x1]  ;;  %v4596_v54 = vld [vmem:[#allocation22 + $0x10] sm:$0xff] }
 0x514   : > { %v2804_v53 = vunpack.c.l.bf16 %v2803_v52 }
 0x515   : > { %v2570_v57 = vpop.f32.mrf.mxu2  ;;  %v2773_v60 = vmax.f32 %v2770_v55, 0.0 }
 0x516   : > { %v2571_v4 = vadd.f32 %v2570_v57, %v2464_v61 }
 0x517   : > { %v2775_v62 = vpack.c.bf16 %v2773_v60, %v2773_v60  ;;  %v2778_v63 = vadd.f32 %v2773_v60, %v2772_v51  ;;  %v4597_v51 = vld [vmem:[#allocation22 + $0x18] sm:$0xff] }
 0x518   : > { %v2585_v10 = vadd.f32 %v2584_v56, %v2571_v4  ;;  %3018 = vmatpush.bf16.msrb.mxu3 %v4597_v51  ;;  %v4618_v4 = vld [vmem:[#allocation26] sm:$0xff] }
 0x519   : > { %v2779_v2 = vrot.slane %v2778_v63, 4  ;;  %v3030_v3 = vunpack.c.l.b16 %v2775_v62 }
 0x51a   : > { %v2589_v15 = vmax.f32 %v2585_v10, 0.0 }
 0x51b   : > { %v2780_v5 = vadd.f32 %v2779_v2, %v2778_v63  ;;  %v3031_v6 = vpack.c.b16 %v3030_v3, %v3029_v1  ;;  %v4621_v63 = vld [vmem:[#allocation26 + $0x18] sm:$0xff]  ;;  %v4620_v1 = vld [vmem:[#allocation26 + $0x10] sm:$0xff]  ;;  %v4594_v2 = vld [vmem:[#allocation22] sm:$0xff] }
 0x51c   : > { %v2776_v20 = vpack.c.bf16 %v2589_v15, %v2589_v15  ;;  %3019 = vmatpush.bf16.msrb.mxu3 %v4596_v54  ;;  %3290 = vmatpush.bf16.msrb.mxu0 %v4621_v63  ;;  %v4619_v3 = vld [vmem:[#allocation26 + $0x8] sm:$0xff] }
 0x51d   : > { %v2572_v8 = vpop.f32.mrf.mxu2  ;;  %v2781_v9 = vrot.slane %v2780_v5, 2  ;;  %3114 = vmatmul.bf16.vlgmr.msra.gmra.mxu1 %v3031_v6  ;;  %v2883_v6 = vld [vmem:[%s6358_s0] sm:$0x1] }
 0x51e   : > { %v2573_v11 = vadd.f32 %v2572_v8, %v2464_v61  ;;  %v3035_v25 = vunpack.c.l.b16 %v2776_v20 }
 0x51f   : > { %v2782_v13 = vadd.f32 %v2781_v9, %v2780_v5  ;;  %v3143_v5 = vld [vmem:[%s6357_s1] sm:$0x1]  ;;  %v2884_v9 = vunpack.c.l.bf16 %v2883_v6 }
 0x520   : > { %v2587_v14 = vadd.f32 %v2586_v12, %v2573_v11  ;;  %3020 = vmatpush.bf16.msrb.mxu3 %v4595_v0  ;;  %3291 = vmatpush.bf16.msrb.mxu0 %v4620_v1  ;;  %v3144_v7 = vunpack.c.l.bf16 %v3143_v5 }
 0x521   : > { %v2783_v17 = vrot.slane %v2782_v13, 1 }
 0x522   : > { %v2590_v16 = vmax.f32 %v2587_v14, 0.0  ;;  %v3145_v10 = vperm.slane %v3144_v7, 0 }
 0x523   : > { %v2784_v19 = vadd.f32 %v2783_v17, %v2782_v13 }
 0x524   : > { %v2777_v18 = vpack.c.bf16 %v2590_v16, %v2590_v16  ;;  %3021 = vmatpush.bf16.msrb.mxu3 %v4594_v2  ;;  %3292 = vmatpush.bf16.msrb.mxu0 %v4619_v3 }
 0x525   : > { %v2785_v21 = vmul.f32 0.0625, %v2784_v19 }
 0x526   : > { %v3036_v24 = vunpack.c.l.b16 %v2777_v18 }
 0x527   : > { %v2786_v23 = vpack.c.bf16 %v2785_v21, %v2785_v21 }
 0x528   : > { %v3037_v26 = vpack.c.b16 %v3036_v24, %v3035_v25  ;;  %3293 = vmatpush.bf16.msrb.mxu0 %v4618_v4 }
 0x529   : > { %2861 = vmatmul.bf16.vlgmr.msrb.gmra.mxu2 %v2786_v23 }
 0x52d   : > { %3119 = vmatmul.bf16.gmra.mxu1 %v3037_v26 }
 0x59a   : > { %v3115_v41 = vpop.f32.mrf.mxu1 }
 0x59b   : > { %v3116_v48 = vadd.f32 %v3115_v41, %v3057_v45 }
 0x5a2   : > { %v3117_v47 = vpop.f32.mrf.mxu1 }
 0x5a3   : > { %v3118_v49 = vadd.f32 %v3117_v47, %v3057_v45 }
 0x5a5   : > { %v3125_v50 = vpack.c.bf16 %v3118_v49, %v3116_v48 }
 0x5a7   : > { %3202 = vmatmul.bf16.vlgmr.msra.gmra.mxu2 %v3125_v50 }
 0x5aa   : > { %v3120_v55 = vpop.f32.mrf.mxu1 }
 0x5ab   : > { %v3121_v59 = vadd.f32 %v3120_v55, %v3057_v45 }
 0x5ac   : > { %v2862_v22 = vpop.f32.mrf.mxu2 }
 0x5ad   : > { %v2863_v56 = vadd.f32 %v2862_v22, %v2804_v53 }
 0x5af   : > { %v2866_v57 = vpack.c.bf16 %v2863_v56, %v2863_v56 }
 0x5b1   : > { %2941 = vmatmul.bf16.vlgmr.msra.gmra.mxu0 %v2866_v57 }
 0x5b2   : > { %v3122_v58 = vpop.f32.mrf.mxu1 }
 0x5b3   : > { %v3123_v60 = vadd.f32 %v3122_v58, %v3057_v45 }
 0x5b4   : > { %v2864_v61 = vpop.f32.mrf.mxu2 }
 0x5b5   : > { %v3126_v62 = vpack.c.bf16 %v3123_v60, %v3121_v59 }
 0x5b7   : > { %3207 = vmatmul.bf16.gmra.mxu2 %v3126_v62 }
 0x62a   : > { %v3203_v8 = vpop.f32.mrf.mxu2 }
 0x62b   : > { %v3204_v13 = vadd.f32 %v3203_v8, %v3145_v10 }
 0x62d   : > { %v3213_v18 = vmax.f32 %v3204_v13, 0.0 }
 0x62e   : > { %v2942_v11 = vpop.f32.mrf.mxu0 }
 0x62f   : > { %v2943_v12 = vadd.f32 %v2942_v11, %v2884_v9 }
 0x631   : > { %v2946_v14 = vmax.f32 %v2943_v12, 0.0 }
 0x632   : > { %v3205_v15 = vpop.f32.mrf.mxu2 }
 0x633   : > { %v2947_v16 = vpack.c.bf16 %v2946_v14, %v2946_v14  ;;  %v3206_v17 = vadd.f32 %v3205_v15, %v3145_v10 }
 0x635   : > { %v3214_v19 = vmax.f32 %v3206_v17, 0.0  ;;  %3022 = vmatmul.bf16.vlgmr.msrb.gmra.mxu3 %v2947_v16 }
 0x636   : > { %v2944_v20 = vpop.f32.mrf.mxu0 }
 0x637   : > { %v3217_v21 = vpack.c.bf16 %v3214_v19, %v3213_v18 }
 0x639   : > { %3294 = vmatmul.bf16.vlgmr.msrb.gmra.mxu0 %v3217_v21 }
 0x63a   : > { %v3208_v23 = vpop.f32.mrf.mxu2 }
 0x63b   : > { %v3209_v24 = vadd.f32 %v3208_v23, %v3145_v10 }
 0x63d   : > { %v3215_v27 = vmax.f32 %v3209_v24, 0.0 }
 0x642   : > { %v3210_v25 = vpop.f32.mrf.mxu2 }
 0x643   : > { %v3211_v26 = vadd.f32 %v3210_v25, %v3145_v10 }
 0x645   : > { %v3216_v28 = vmax.f32 %v3211_v26, 0.0 }
 0x647   : > { %v3218_v29 = vpack.c.bf16 %v3216_v28, %v3215_v27 }
 0x649   : > { %3299 = vmatmul.bf16.gmra.mxu0 %v3218_v29 }
 0x6b6   : > { %v3295_v36 = vpop.f32.mrf.mxu0 }
 0x6b7   : > { %v3296_v37 = vadd.f32 %v3295_v36, %v3237_v34 }
 0x6b8   : > { %v3023_v38 = vpop.f32.mrf.mxu3 }
 0x6b9   : > { %3305 = vst [vmem:[%s6196_s23] sm:$0xff] %v3296_v37  ;;  %v3024_v39 = vadd.f32 %v3023_v38, %v2965_v35 }
 0x6bb   : > { %3309 = vst [vmem:[%s1584_s20] sm:$0x1] %v3024_v39 }
 0x6bc   : > { %5328 = shalt.err (!%p5325_p10)
}
 0x6bd   : > { %s6363_s15 = sld [smem:[#allocation67_spill]]  ;;  %s4626_s10 = sshll.u32 %s6337_s26, 5 }
 0x6be   : > { %4672 = dma.vmem_to_hbm [thread:$0]  (%p5764_p9), %s3344_s27, 16, %s3346_s14, %s3316_s22   ;;  %v3297_v40 = vpop.f32.mrf.mxu0 }
 0x6bf   : > { %v3298_v41 = vadd.f32 %v3297_v40, %v3237_v34  ;;  %s3327_s0 = sshll.u32 %s6196_s23, 4  ;;  %s3311_s28 = scalar_lea.sflag [#allocation4], %s5986_s16  ;;  %s3328_s0 = int_to_ptr.vmem [resolvable:$true] %s3327_s0 }
 0x6c0   : > { %v3025_v42 = vpop.f32.mrf.mxu3 }
 0x6c1   : > { %3306 = vst [vmem:[%s6196_s23 + $0x8] sm:$0xff] %v3298_v41 }
 0x6c3   : > { %s3326_s1 = scalar_lea.hbm %s6363_s15, %s4626_s10  ;;  %s5349_s26 = scalar_lea.hbm %s6363_s15, 64 }
 0x6c4   : > { %s3329_s12 = sshll.u32 %s3326_s1, 4  ;;  %s3330_s12 = int_to_ptr.hbm [resolvable:$true] %s3329_s12 }
 0x6c5   : > { %s5343_s18 = sshra.s32 %s3330_s12, 4  ;;  %s5344_s18 = int_to_ptr.hbm [resolvable:$true] %s5343_s18 }
 0x6c6   : > { %v3300_v43 = vpop.f32.mrf.mxu0  ;;  %s5345_s8 = scalar_lea.hbm %s5344_s18, 32  ;;  %p5350_p5 = scmp.lt.s32.totalorder %s5344_s18, %s6363_s15 }
 0x6c7   : > { %v3301_v44 = vadd.f32 %v3300_v43, %v3237_v34  ;;  %p5346_p8 = scmp.ne.s32.totalorder %s5344_s18, %s5345_s8  ;;  %p5351_p13 = scmp.lt.s32.totalorder %s5349_s26, %s5345_s8 }
 0x6c9   : > { %3307 = vst [vmem:[%s6196_s23 + $0x10] sm:$0xff] %v3301_v44  ;;  %p5347_p1 = pnand %p5346_p8, %p5764_p9  ;;  %p5352_p0 = por %p5351_p13, %p5350_p5 }
 0x6cb   : > { %p5348_p7 = pneg %p5347_p1 }
 0x6cd   : > { %p5353_p2 = pnand %p5352_p0, %p5348_p7 }
 0x6ce   : > { %v3302_v45 = vpop.f32.mrf.mxu0 }
 0x6cf   : > { %v3303_v30 = vadd.f32 %v3302_v45, %v3237_v34 }
 0x6d1   : > { %3308 = vst [vmem:[%s6196_s23 + $0x18] sm:$0xff] %v3303_v30 }
 0x6d2   : > { %5356 = shalt.err (!%p5353_p2)
}
 0x6d3   : > { %s5477_s20 = smov 128   ;;  %s5478_s27 = smov 8  }
 0x6d4   : > { %4671 = dma.vmem_to_hbm [thread:$0]  (%p5764_p9), %s3328_s0, 512, %s3330_s12, %s3311_s28, %s5477_s20, %s5477_s20, %s5478_s27  }
 0x6d5 PF: > { %s6364_s16 = sld [smem:[#allocation69_spill]]  ;;  %p6366_p4 = scmp.ge.s32.totalorder %s5435_s2, 2 }
 0x6d7   : > { %p4726_p12 = pnand %p6366_p4, %p5772_p3 }
 0x6d9   : > { %p4727_p11 = pneg %p4726_p12 }
 0x6db   : > { %s3357_s23 = sand.u32 1, %s6364_s16  }
 0x6dc   : > { %s3358_s22 = scalar_lea.sflag [#allocation4], %s3357_s23 }
 0x6dd   : > { %5414 = dma.done.wait (%p4727_p11), %s3358_s22, 512  }
 0x6de   : > { %5416 = vsyncadd (%p4727_p11), %s3358_s22, 4294966784  ;;  %s3368_s30 = scalar_lea.sflag [#allocation30], %s3357_s23 }
 0x6df   : > { %5418 = dma.done.wait (%p4727_p11), %s3368_s30, 16  }
 0x6e0   : > { %5420 = vsyncadd (%p4727_p11), %s3368_s30, 4294967280  ;;  %s6367_s2 = sld [smem:[#allocation74_spill]] }
 0x6e1   : > { %s6368_s0 = sld [smem:[#allocation70_spill]] }
 0x6e2   : > { %s6369_s28 = sld [smem:[#allocation71_spill]] }
 0x6e3   : > { %s6370_s1 = sld [smem:[#allocation75_spill]] }
 0x6e6   : > { %p100_p9 = scmp.ge.s32.totalorder %s6367_s2, 4  }
 0x6e8   :  { %102 = sbr.rel (!%p100_p9) target bundleno = 86 (0x56), region = 398 }
 0x6ed   :  { %3373 = vsyncpa [#allocation3], 1 }
 0x6ee   :  { %3375 = vsyncpa [#allocation3 + $0x1], 1 }
 0x6ef   :  { %3376 = vsyncpa [#allocation6], 1 }
 0x6f0   :  { %3378 = vsyncpa [#allocation6 + $0x1], 1 }
 0x6f1   :  { %3379 = vsyncpa [#allocation9], 1 }
 0x6f2   :  { %3381 = vsyncpa [#allocation9 + $0x1], 1 }
 0x6f3   :  { %3382 = vsyncpa [#allocation12], 1 }
 0x6f4   :  { %3384 = vsyncpa [#allocation12 + $0x1], 1 }
 0x6f5   :  { %3385 = vsyncpa [#allocation15], 1 }
 0x6f6   :  { %3387 = vsyncpa [#allocation15 + $0x1], 1 }
 0x6f7   :  { %3388 = vsyncpa [#allocation18], 1 }
 0x6f8   :  { %3390 = vsyncpa [#allocation18 + $0x1], 1 }
 0x6f9   :  { %3391 = vsyncpa [#allocation21], 1 }
 0x6fa   :  { %3392 = vsyncpa [#allocation24], 1 }
 0x6fb   :  { %3393 = vsyncpa [#allocation27], 1 }
 0x6fc   :  { %3394 = vsyncpa [#allocation4], 1 }
 0x6fd   :  { %3396 = vsyncpa [#allocation4 + $0x1], 1 }
 0x6fe   :  { %3397 = vsyncpa [#allocation30], 1 }
 0x6ff   :  { %3399 = vsyncpa [#allocation30 + $0x1], 1 }

</bundles_post_ra>
